<compile_context>
chip_gen: v6e
topology: v6e:2x2x1
jax: 0.10.0
libtpu: 0.0.40
codegen_flags: <defaults>
</compile_context>

<pallas_src>
import math
import functools

import jax
import jax.numpy as jnp
from jax.experimental import pallas as pl
from jax.experimental.pallas import tpu as pltpu

# ----------------------------- small config ---------------------------------
B = 2            # batch
S = 8            # sequence length
D = 32           # hidden size
N_HEADS = 2
DH = D // N_HEADS
N_LAYERS = 2     # transformer blocks
FFN = 64         # feed-forward hidden dim
V = 100          # vocab size
P = 16           # max position embeddings
NUM_CLASSES = 6
DIS_LAMBDA = 0.01   # anneal=False -> constant
LN_EPS = 1e-12

_VMEM = pl.BlockSpec(memory_space=pltpu.MemorySpace.VMEM)


# ----------------------------- kernel helpers --------------------------------

def _dot(a, b):
    # bf16 MXU inputs, f32 accumulation (native on v6e/v7x, fine on v5e).
    return jnp.dot(a.astype(jnp.bfloat16), b.astype(jnp.bfloat16),
                   preferred_element_type=jnp.float32)


def _ln(x, g, b, eps=LN_EPS):
    mean = jnp.mean(x, axis=-1, keepdims=True)
    xc = x - mean
    var = jnp.mean(xc * xc, axis=-1, keepdims=True)
    return xc * jax.lax.rsqrt(var + eps) * g + b


def _gelu(x):
    # exact (erf) GELU, matches torch.nn.functional.gelu default
    return 0.5 * x * (1.0 + jax.lax.erf(x * (1.0 / math.sqrt(2.0))))


# ----------------------------- Pallas kernels --------------------------------

def _embed_ln_kernel(we_ref, pos_ref, g_ref, b_ref, o_ref):
    # we: (B,S,D) gathered word embeddings; pos: (1,S,D); g/b: (1,1,D)
    x = we_ref[...] + pos_ref[...]
    o_ref[...] = _ln(x, g_ref[...], b_ref[...])


def _block_kernel(h_ref, mask_ref, wqkv_ref, bqkv_ref, wo_ref, bo_ref,
                  ln1g_ref, ln1b_ref, w1_ref, b1_ref, w2_ref, b2_ref,
                  ln2g_ref, ln2b_ref, o_ref):
    # h: (B*S, D); mask: (B, S); wqkv: (D, 3D); everything VMEM-resident.
    h = h_ref[...]
    qkv = _dot(h, wqkv_ref[...]) + bqkv_ref[...]          # (B*S, 3D)

    scale = 1.0 / math.sqrt(DH)
    neg = jnp.finfo(jnp.float32).min
    ctx_rows = []
    for b in range(B):                                    # static Python loops
        m = mask_ref[b:b + 1, :]                          # (1, S)
        qkv_b = qkv[b * S:(b + 1) * S, :]                 # (S, 3D)
        heads = []
        for hh in range(N_HEADS):
            q = qkv_b[:, hh * DH:(hh + 1) * DH]
            k = qkv_b[:, D + hh * DH:D + (hh + 1) * DH]
            v = qkv_b[:, 2 * D + hh * DH:2 * D + (hh + 1) * DH]
            # DistilBERT scales q before the matmul
            scores = jax.lax.dot_general(
                (q * scale).astype(jnp.bfloat16), k.astype(jnp.bfloat16),
                dimension_numbers=(((1,), (1,)), ((), ())),
                preferred_element_type=jnp.float32)       # (S, S)
            scores = jnp.where(m == 0.0, neg, scores)
            mx = jnp.max(scores, axis=-1, keepdims=True)
            p = jnp.exp(scores - mx)
            # guard only matters for an all-masked row (NaN in torch too)
            p = p / jnp.maximum(jnp.sum(p, axis=-1, keepdims=True), 1e-30)
            heads.append(_dot(p, v))                      # (S, DH)
        ctx_rows.append(jnp.concatenate(heads, axis=-1))  # (S, D)
    ctx = jnp.concatenate(ctx_rows, axis=0)               # (B*S, D)

    sa = _dot(ctx, wo_ref[...]) + bo_ref[...]
    h1 = _ln(sa + h, ln1g_ref[...], ln1b_ref[...])        # fused residual + LN

    ff = _gelu(_dot(h1, w1_ref[...]) + b1_ref[...])
    ff = _dot(ff, w2_ref[...]) + b2_ref[...]
    o_ref[...] = _ln(ff + h1, ln2g_ref[...], ln2b_ref[...])


def _head_kernel(h_ref, cls_ref, wqa_ref, bqa_ref,
                 w0_ref, b0_ref, w1_ref, b1_ref, wf_ref, bf_ref,
                 qa_ref, kld_ref):
    # QA head
    qa_ref[...] = _dot(h_ref[...], wqa_ref[...]) + bqa_ref[...]   # (B*S, 2)
    # Domain discriminator (2 ReLU hidden layers, dropout=eval -> identity)
    x = jnp.maximum(_dot(cls_ref[...], w0_ref[...]) + b0_ref[...], 0.0)
    x = jnp.maximum(_dot(x, w1_ref[...]) + b1_ref[...], 0.0)
    logits = _dot(x, wf_ref[...]) + bf_ref[...]                   # (B, C)
    mx = jnp.max(logits, axis=-1, keepdims=True)
    sh = logits - mx
    logp = sh - jnp.log(jnp.sum(jnp.exp(sh), axis=-1, keepdims=True))
    # KLDivLoss(reduction='batchmean') against the uniform distribution
    t = 1.0 / NUM_CLASSES
    per_row = jnp.sum(t * (math.log(t) - logp), axis=-1, keepdims=True)  # (B,1)
    kld_ref[...] = jnp.sum(per_row, axis=0, keepdims=True) * (1.0 / B)   # (1,1)


# ----------------------------- wrappers ---------------------------------------

def embed_layernorm(wemb, pos, g, b):
    return pl.pallas_call(
        _embed_ln_kernel,
        out_shape=jax.ShapeDtypeStruct((B, S, D), jnp.float32),
        in_specs=[_VMEM] * 4,
        out_specs=_VMEM,
    )(wemb, pos, g, b)


def transformer_block(h, mask, lp):
    return pl.pallas_call(
        _block_kernel,
        out_shape=jax.ShapeDtypeStruct((B * S, D), jnp.float32),
        in_specs=[_VMEM] * 14,
        out_specs=_VMEM,
    )(h, mask, lp["wqkv"], lp["bqkv"], lp["wo"], lp["bo"],
      lp["ln1_g"], lp["ln1_b"], lp["w1"], lp["b1"], lp["w2"], lp["b2"],
      lp["ln2_g"], lp["ln2_b"])


def qa_disc_head(h, cls, params):
    d = params["disc"]
    return pl.pallas_call(
        _head_kernel,
        out_shape=(jax.ShapeDtypeStruct((B * S, 2), jnp.float32),
                   jax.ShapeDtypeStruct((1, 1), jnp.float32)),
        in_specs=[_VMEM] * 10,
        out_specs=(_VMEM, _VMEM),
    )(h, cls, params["wqa"], params["bqa"],
      d["w0"], d["b0"], d["w1"], d["b1"], d["wf"], d["bf"])


# ----------------------------- parameters -------------------------------------

def init_params(key):
    def nrm(k, shape):
        return 0.02 * jax.random.normal(k, shape, jnp.float32)

    keys = iter(jax.random.split(key, 128))
    p = {
        "word_emb": nrm(next(keys), (V, D)),
        "pos_emb": nrm(next(keys), (P, D)),
        "emb_ln_g": jnp.ones((1, 1, D), jnp.float32),
        "emb_ln_b": jnp.zeros((1, 1, D), jnp.float32),
        "layers": [],
    }
    for _ in range(N_LAYERS):
        wq, wk, wv = (nrm(next(keys), (D, D)) for _ in range(3))
        lp = {
            # fused QKV projection: single (D, 3D) matmul per layer
            "wqkv": jnp.concatenate([wq, wk, wv], axis=1),
            "bqkv": jnp.zeros((1, 3 * D), jnp.float32),
            "wo": nrm(next(keys), (D, D)), "bo": jnp.zeros((1, D), jnp.float32),
            "ln1_g": jnp.ones((1, D), jnp.float32), "ln1_b": jnp.zeros((1, D), jnp.float32),
            "w1": nrm(next(keys), (D, FFN)), "b1": jnp.zeros((1, FFN), jnp.float32),
            "w2": nrm(next(keys), (FFN, D)), "b2": jnp.zeros((1, D), jnp.float32),
            "ln2_g": jnp.ones((1, D), jnp.float32), "ln2_b": jnp.zeros((1, D), jnp.float32),
        }
        p["layers"].append(lp)
    p["wqa"] = nrm(next(keys), (D, 2))
    p["bqa"] = jnp.zeros((1, 2), jnp.float32)
    # Domain discriminator (concat=False -> input_size = hidden_size = D).
    # NOTE: the torch module also constructs hidden_layers[2] but never uses
    # it in forward (loop runs range(num_layers-1) then jumps to [-1]); we
    # mirror that by simply not using it.
    p["disc"] = {
        "w0": nrm(next(keys), (D, D)), "b0": jnp.zeros((1, D), jnp.float32),
        "w1": nrm(next(keys), (D, D)), "b1": jnp.zeros((1, D), jnp.float32),
        "wf": nrm(next(keys), (D, NUM_CLASSES)), "bf": jnp.zeros((1, NUM_CLASSES), jnp.float32),
    }
    return p


# ----------------------------- model forward ----------------------------------

def _cross_entropy(logits, positions, ignored_index):
    # matches torch CrossEntropyLoss(ignore_index=ignored_index) with
    # positions clamped to [0, ignored_index] as in DistilBertForQuestionAnswering
    pos = jnp.clip(positions, 0, ignored_index)
    logp = jax.nn.log_softmax(logits, axis=-1)
    valid = (pos != ignored_index).astype(jnp.float32)
    safe_pos = jnp.where(pos == ignored_index, 0, pos)
    nll = -jnp.take_along_axis(logp, safe_pos[:, None], axis=-1)[:, 0]
    return jnp.sum(nll * valid) / jnp.maximum(jnp.sum(valid), 1.0)


@jax.jit
def forward_qa(params, input_ids, attention_mask, start_positions, end_positions):
    Bb, Ss = input_ids.shape

    # --- DistilBERT embeddings (hidden_states[0]); gather stays in JAX ---
    wemb = jnp.take(params["word_emb"], input_ids, axis=0)              # (B,S,D)
    pos = params["pos_emb"][:Ss].reshape(1, Ss, D)
    emb = embed_layernorm(wemb, pos, params["emb_ln_g"], params["emb_ln_b"])
    # (dropout is a no-op in eval mode)

    mask = attention_mask.astype(jnp.float32)                           # (B,S)

    # --- transformer blocks: one fused Pallas kernel per block ---
    h = emb.reshape(Bb * Ss, D)
    for lp in params["layers"]:
        h = transformer_block(h, mask, lp)

    # --- fused epilogue: QA logits + discriminator(log_softmax) + KLD ---
    cls = emb[:, 0]                                                     # (B,D)
    qa_logits, kld = qa_disc_head(h, cls, params)
    qa_logits = qa_logits.reshape(Bb, Ss, 2)
    start_logits = qa_logits[..., 0]
    end_logits = qa_logits[..., 1]

    ignored_index = Ss
    start_loss = _cross_entropy(start_logits, start_positions, ignored_index)
    end_loss = _cross_entropy(end_logits, end_positions, ignored_index)
    qa_loss = 0.5 * (start_loss + end_loss)

    return qa_loss + DIS_LAMBDA * kld[0, 0]


# --------------------------------- main ----------------------------------------

if __name__ == "__main__":
    pkey = jax.random.PRNGKey(0)
    params = init_params(pkey)

    dkey = jax.random.PRNGKey(0)
    k_ids, k_s, k_e = jax.random.split(dkey, 3)
    input_ids = jax.random.randint(k_ids, (B, S), 0, V, dtype=jnp.int32)
    attention_mask = jnp.ones((B, S), jnp.float32)
    start_positions = jax.random.randint(k_s, (B,), 0, S, dtype=jnp.int32)
    end_positions = jax.random.randint(k_e, (B,), 0, S, dtype=jnp.int32)

    loss = forward_qa(params, input_ids, attention_mask, start_positions, end_positions)
    jax.block_until_ready(loss)
    print("KERNEL_OK")
</pallas_src>

<mosaic_0001>
module attributes {stable_mosaic.version = 11 : i64} {
  func.func @_embed_ln_kernel(%arg0: memref<2x8x32xf32, #tpu.memory_space<vmem>>, %arg1: memref<1x8x32xf32, #tpu.memory_space<vmem>>, %arg2: memref<1x1x32xf32, #tpu.memory_space<vmem>>, %arg3: memref<1x1x32xf32, #tpu.memory_space<vmem>>, %arg4: memref<2x8x32xf32, #tpu.memory_space<vmem>>) attributes {dimension_semantics = [], scalar_prefetch = 0 : i64, scratch_operands = 0 : i64, tpu.core_type = #tpu.core_type<tc>} {
    %c0 = arith.constant 0 : index
    %c0_0 = arith.constant 0 : index
    %c0_1 = arith.constant 0 : index
    %0 = vector.load %arg0[%c0, %c0_0, %c0_1] : memref<2x8x32xf32, #tpu.memory_space<vmem>>, vector<2x8x32xf32>
    %c0_2 = arith.constant 0 : index
    %c0_3 = arith.constant 0 : index
    %c0_4 = arith.constant 0 : index
    %1 = vector.load %arg1[%c0_2, %c0_3, %c0_4] : memref<1x8x32xf32, #tpu.memory_space<vmem>>, vector<1x8x32xf32>
    %2 = vector.broadcast %1 : vector<1x8x32xf32> to vector<2x8x32xf32>
    %3 = arith.addf %0, %2 : vector<2x8x32xf32>
    %c0_5 = arith.constant 0 : index
    %c0_6 = arith.constant 0 : index
    %c0_7 = arith.constant 0 : index
    %4 = vector.load %arg2[%c0_5, %c0_6, %c0_7] : memref<1x1x32xf32, #tpu.memory_space<vmem>>, vector<1x1x32xf32>
    %c0_8 = arith.constant 0 : index
    %c0_9 = arith.constant 0 : index
    %c0_10 = arith.constant 0 : index
    %5 = vector.load %arg3[%c0_8, %c0_9, %c0_10] : memref<1x1x32xf32, #tpu.memory_space<vmem>>, vector<1x1x32xf32>
    %cst = arith.constant dense<0.000000e+00> : vector<2x8xf32>
    %6 = vector.multi_reduction <add>, %3, %cst [2] : vector<2x8x32xf32> to vector<2x8xf32>
    %7 = vector.shape_cast %6 : vector<2x8xf32> to vector<2x8x1xf32>
    %cst_11 = arith.constant 3.200000e+01 : f32
    %8 = vector.broadcast %cst_11 : f32 to vector<2x8x1xf32>
    %9 = arith.divf %7, %8 : vector<2x8x1xf32>
    %10 = vector.broadcast %9 : vector<2x8x1xf32> to vector<2x8x32xf32>
    %11 = arith.subf %3, %10 : vector<2x8x32xf32>
    %12 = arith.mulf %11, %11 : vector<2x8x32xf32>
    %cst_12 = arith.constant dense<0.000000e+00> : vector<2x8xf32>
    %13 = vector.multi_reduction <add>, %12, %cst_12 [2] : vector<2x8x32xf32> to vector<2x8xf32>
    %14 = vector.shape_cast %13 : vector<2x8xf32> to vector<2x8x1xf32>
    %cst_13 = arith.constant 3.200000e+01 : f32
    %15 = vector.broadcast %cst_13 : f32 to vector<2x8x1xf32>
    %16 = arith.divf %14, %15 : vector<2x8x1xf32>
    %cst_14 = arith.constant 9.99999996E-13 : f32
    %17 = vector.broadcast %cst_14 : f32 to vector<2x8x1xf32>
    %18 = arith.addf %16, %17 : vector<2x8x1xf32>
    %19 = math.rsqrt %18 : vector<2x8x1xf32>
    %20 = vector.broadcast %19 : vector<2x8x1xf32> to vector<2x8x32xf32>
    %21 = arith.mulf %11, %20 : vector<2x8x32xf32>
    %22 = vector.broadcast %4 : vector<1x1x32xf32> to vector<2x8x32xf32>
    %23 = arith.mulf %21, %22 : vector<2x8x32xf32>
    %24 = vector.broadcast %5 : vector<1x1x32xf32> to vector<2x8x32xf32>
    %25 = arith.addf %23, %24 : vector<2x8x32xf32>
    %c0_15 = arith.constant 0 : index
    %c0_16 = arith.constant 0 : index
    %c0_17 = arith.constant 0 : index
    %26 = vector.load %arg4[%c0_15, %c0_16, %c0_17] : memref<2x8x32xf32, #tpu.memory_space<vmem>>, vector<2x8x32xf32>
    tpu.vector_store %arg4[%c0_15, %c0_16, %c0_17], %25 {strides = array<i32>} : memref<2x8x32xf32, #tpu.memory_space<vmem>>, vector<2x8x32xf32>,
    return
  }
}

module attributes {stable_mosaic.version = 11 : i64} {
  func.func @_block_kernel(%arg0: memref<16x32xf32, #tpu.memory_space<vmem>>, %arg1: memref<2x8xf32, #tpu.memory_space<vmem>>, %arg2: memref<32x96xf32, #tpu.memory_space<vmem>>, %arg3: memref<1x96xf32, #tpu.memory_space<vmem>>, %arg4: memref<32x32xf32, #tpu.memory_space<vmem>>, %arg5: memref<1x32xf32, #tpu.memory_space<vmem>>, %arg6: memref<1x32xf32, #tpu.memory_space<vmem>>, %arg7: memref<1x32xf32, #tpu.memory_space<vmem>>, %arg8: memref<32x64xf32, #tpu.memory_space<vmem>>, %arg9: memref<1x64xf32, #tpu.memory_space<vmem>>, %arg10: memref<64x32xf32, #tpu.memory_space<vmem>>, %arg11: memref<1x32xf32, #tpu.memory_space<vmem>>, %arg12: memref<1x32xf32, #tpu.memory_space<vmem>>, %arg13: memref<1x32xf32, #tpu.memory_space<vmem>>, %arg14: memref<16x32xf32, #tpu.memory_space<vmem>>) attributes {dimension_semantics = [], scalar_prefetch = 0 : i64, scratch_operands = 0 : i64, tpu.core_type = #tpu.core_type<tc>} {
    %c0 = arith.constant 0 : index
    %c0_0 = arith.constant 0 : index
    %0 = vector.load %arg0[%c0, %c0_0] : memref<16x32xf32, #tpu.memory_space<vmem>>, vector<16x32xf32>
    %c0_1 = arith.constant 0 : index
    %c0_2 = arith.constant 0 : index
    %1 = vector.load %arg2[%c0_1, %c0_2] : memref<32x96xf32, #tpu.memory_space<vmem>>, vector<32x96xf32>
    %2 = arith.truncf %0 : vector<16x32xf32> to vector<16x32xbf16>
    %3 = arith.truncf %1 : vector<32x96xf32> to vector<32x96xbf16>
    %cst = arith.constant dense<0.000000e+00> : vector<16x96xf32>
    %4 = tpu.matmul %2, %3, %cst {dimension_numbers = #tpu.dot_dimension_numbers<[1], [0], [0], [1], [0, 0, 1, 1], [], []>} : vector<16x32xbf16>, vector<32x96xbf16>, vector<16x96xf32> -> vector<16x96xf32>
    %c0_3 = arith.constant 0 : index
    %c0_4 = arith.constant 0 : index
    %5 = vector.load %arg3[%c0_3, %c0_4] : memref<1x96xf32, #tpu.memory_space<vmem>>, vector<1x96xf32>
    %6 = vector.broadcast %5 : vector<1x96xf32> to vector<16x96xf32>
    %7 = arith.addf %4, %6 : vector<16x96xf32>
    %c0_5 = arith.constant 0 : index
    %c0_6 = arith.constant 0 : index
    %8 = vector.load %arg1[%c0_5, %c0_6] : memref<2x8xf32, #tpu.memory_space<vmem>>, vector<1x8xf32>
    %9 = vector.extract_strided_slice %7 {offsets = [0, 0], sizes = [8, 96], strides = [1, 1]} : vector<16x96xf32> to vector<8x96xf32>
    %10 = vector.extract_strided_slice %9 {offsets = [0, 0], sizes = [8, 16], strides = [1, 1]} : vector<8x96xf32> to vector<8x16xf32>
    %11 = vector.extract_strided_slice %9 {offsets = [0, 32], sizes = [8, 16], strides = [1, 1]} : vector<8x96xf32> to vector<8x16xf32>
    %12 = vector.extract_strided_slice %9 {offsets = [0, 64], sizes = [8, 16], strides = [1, 1]} : vector<8x96xf32> to vector<8x16xf32>
    %cst_7 = arith.constant 2.500000e-01 : f32
    %13 = vector.broadcast %cst_7 : f32 to vector<8x16xf32>
    %14 = arith.mulf %10, %13 : vector<8x16xf32>
    %15 = arith.truncf %14 : vector<8x16xf32> to vector<8x16xbf16>
    %16 = arith.truncf %11 : vector<8x16xf32> to vector<8x16xbf16>
    %cst_8 = arith.constant dense<0.000000e+00> : vector<8x8xf32>
    %17 = tpu.matmul %15, %16, %cst_8 {dimension_numbers = #tpu.dot_dimension_numbers<[1], [1], [0], [0], [0, 0, 1, 0], [], []>} : vector<8x16xbf16>, vector<8x16xbf16>, vector<8x8xf32> -> vector<8x8xf32>
    %cst_9 = arith.constant 0.000000e+00 : f32
    %18 = vector.broadcast %cst_9 : f32 to vector<1x8xf32>
    %19 = arith.cmpf oeq, %8, %18 : vector<1x8xf32>
    %cst_10 = arith.constant -3.40282347E+38 : f32
    %20 = vector.shape_cast %19 : vector<1x8xi1> to vector<1x8xi1>
    %21 = vector.broadcast %20 : vector<1x8xi1> to vector<8x8xi1>
    %22 = vector.broadcast %cst_10 : f32 to vector<8x8xf32>
    %23 = arith.select %21, %22, %17 : vector<8x8xi1>, vector<8x8xf32>
    %cst_11 = arith.constant dense<0xFF800000> : vector<8xf32>
    %24 = vector.multi_reduction <maximumf>, %23, %cst_11 [1] : vector<8x8xf32> to vector<8xf32>
    %25 = vector.shape_cast %24 : vector<8xf32> to vector<8x1xf32>
    %26 = vector.broadcast %25 : vector<8x1xf32> to vector<8x8xf32>
    %27 = arith.subf %23, %26 : vector<8x8xf32>
    %28 = math.exp %27 : vector<8x8xf32>
    %cst_12 = arith.constant dense<0.000000e+00> : vector<8xf32>
    %29 = vector.multi_reduction <add>, %28, %cst_12 [1] : vector<8x8xf32> to vector<8xf32>
    %30 = vector.shape_cast %29 : vector<8xf32> to vector<8x1xf32>
    %cst_13 = arith.constant 1.000000e-30 : f32
    %31 = vector.broadcast %cst_13 : f32 to vector<8x1xf32>
    %32 = arith.maximumf %30, %31 : vector<8x1xf32>
    %33 = vector.broadcast %32 : vector<8x1xf32> to vector<8x8xf32>
    %34 = arith.divf %28, %33 : vector<8x8xf32>
    %35 = arith.truncf %34 : vector<8x8xf32> to vector<8x8xbf16>
    %36 = arith.truncf %12 : vector<8x16xf32> to vector<8x16xbf16>
    %cst_14 = arith.constant dense<0.000000e+00> : vector<8x16xf32>
    %37 = tpu.matmul %35, %36, %cst_14 {dimension_numbers = #tpu.dot_dimension_numbers<[1], [0], [0], [1], [0, 0, 1, 1], [], []>} : vector<8x8xbf16>, vector<8x16xbf16>, vector<8x16xf32> -> vector<8x16xf32>
    %38 = vector.extract_strided_slice %9 {offsets = [0, 16], sizes = [8, 16], strides = [1, 1]} : vector<8x96xf32> to vector<8x16xf32>
    %39 = vector.extract_strided_slice %9 {offsets = [0, 48], sizes = [8, 16], strides = [1, 1]} : vector<8x96xf32> to vector<8x16xf32>
    %40 = vector.extract_strided_slice %9 {offsets = [0, 80], sizes = [8, 16], strides = [1, 1]} : vector<8x96xf32> to vector<8x16xf32>
    %cst_15 = arith.constant 2.500000e-01 : f32
    %41 = vector.broadcast %cst_15 : f32 to vector<8x16xf32>
    %42 = arith.mulf %38, %41 : vector<8x16xf32>
    %43 = arith.truncf %42 : vector<8x16xf32> to vector<8x16xbf16>
    %44 = arith.truncf %39 : vector<8x16xf32> to vector<8x16xbf16>
    %cst_16 = arith.constant dense<0.000000e+00> : vector<8x8xf32>
    %45 = tpu.matmul %43, %44, %cst_16 {dimension_numbers = #tpu.dot_dimension_numbers<[1], [1], [0], [0], [0, 0, 1, 0], [], []>} : vector<8x16xbf16>, vector<8x16xbf16>, vector<8x8xf32> -> vector<8x8xf32>
    %cst_17 = arith.constant 0.000000e+00 : f32
    %46 = vector.broadcast %cst_17 : f32 to vector<1x8xf32>
    %47 = arith.cmpf oeq, %8, %46 : vector<1x8xf32>
    %cst_18 = arith.constant -3.40282347E+38 : f32
    %48 = vector.shape_cast %47 : vector<1x8xi1> to vector<1x8xi1>
    %49 = vector.broadcast %48 : vector<1x8xi1> to vector<8x8xi1>
    %50 = vector.broadcast %cst_18 : f32 to vector<8x8xf32>
    %51 = arith.select %49, %50, %45 : vector<8x8xi1>, vector<8x8xf32>
    %cst_19 = arith.constant dense<0xFF800000> : vector<8xf32>
    %52 = vector.multi_reduction <maximumf>, %51, %cst_19 [1] : vector<8x8xf32> to vector<8xf32>
    %53 = vector.shape_cast %52 : vector<8xf32> to vector<8x1xf32>
    %54 = vector.broadcast %53 : vector<8x1xf32> to vector<8x8xf32>
    %55 = arith.subf %51, %54 : vector<8x8xf32>
    %56 = math.exp %55 : vector<8x8xf32>
    %cst_20 = arith.constant dense<0.000000e+00> : vector<8xf32>
    %57 = vector.multi_reduction <add>, %56, %cst_20 [1] : vector<8x8xf32> to vector<8xf32>
    %58 = vector.shape_cast %57 : vector<8xf32> to vector<8x1xf32>
    %cst_21 = arith.constant 1.000000e-30 : f32
    %59 = vector.broadcast %cst_21 : f32 to vector<8x1xf32>
    %60 = arith.maximumf %58, %59 : vector<8x1xf32>
    %61 = vector.broadcast %60 : vector<8x1xf32> to vector<8x8xf32>
    %62 = arith.divf %56, %61 : vector<8x8xf32>
    %63 = arith.truncf %62 : vector<8x8xf32> to vector<8x8xbf16>
    %64 = arith.truncf %40 : vector<8x16xf32> to vector<8x16xbf16>
    %cst_22 = arith.constant dense<0.000000e+00> : vector<8x16xf32>
    %65 = tpu.matmul %63, %64, %cst_22 {dimension_numbers = #tpu.dot_dimension_numbers<[1], [0], [0], [1], [0, 0, 1, 1], [], []>} : vector<8x8xbf16>, vector<8x16xbf16>, vector<8x16xf32> -> vector<8x16xf32>
    %66 = tpu.concatenate %37, %65 in 1 : vector<8x16xf32>, vector<8x16xf32> -> vector<8x32xf32>
    %c1 = arith.constant 1 : index
    %c0_23 = arith.constant 0 : index
    %67 = vector.load %arg1[%c1, %c0_23] : memref<2x8xf32, #tpu.memory_space<vmem>>, vector<1x8xf32>
    %68 = vector.extract_strided_slice %7 {offsets = [8, 0], sizes = [8, 96], strides = [1, 1]} : vector<16x96xf32> to vector<8x96xf32>
    %69 = vector.extract_strided_slice %68 {offsets = [0, 0], sizes = [8, 16], strides = [1, 1]} : vector<8x96xf32> to vector<8x16xf32>
    %70 = vector.extract_strided_slice %68 {offsets = [0, 32], sizes = [8, 16], strides = [1, 1]} : vector<8x96xf32> to vector<8x16xf32>
    %71 = vector.extract_strided_slice %68 {offsets = [0, 64], sizes = [8, 16], strides = [1, 1]} : vector<8x96xf32> to vector<8x16xf32>
    %cst_24 = arith.constant 2.500000e-01 : f32
    %72 = vector.broadcast %cst_24 : f32 to vector<8x16xf32>
    %73 = arith.mulf %69, %72 : vector<8x16xf32>
    %74 = arith.truncf %73 : vector<8x16xf32> to vector<8x16xbf16>
    %75 = arith.truncf %70 : vector<8x16xf32> to vector<8x16xbf16>
    %cst_25 = arith.constant dense<0.000000e+00> : vector<8x8xf32>
    %76 = tpu.matmul %74, %75, %cst_25 {dimension_numbers = #tpu.dot_dimension_numbers<[1], [1], [0], [0], [0, 0, 1, 0], [], []>} : vector<8x16xbf16>, vector<8x16xbf16>, vector<8x8xf32> -> vector<8x8xf32>
    %cst_26 = arith.constant 0.000000e+00 : f32
    %77 = vector.broadcast %cst_26 : f32 to vector<1x8xf32>
    %78 = arith.cmpf oeq, %67, %77 : vector<1x8xf32>
    %cst_27 = arith.constant -3.40282347E+38 : f32
    %79 = vector.shape_cast %78 : vector<1x8xi1> to vector<1x8xi1>
    %80 = vector.broadcast %79 : vector<1x8xi1> to vector<8x8xi1>
    %81 = vector.broadcast %cst_27 : f32 to vector<8x8xf32>
    %82 = arith.select %80, %81, %76 : vector<8x8xi1>, vector<8x8xf32>
    %cst_28 = arith.constant dense<0xFF800000> : vector<8xf32>
    %83 = vector.multi_reduction <maximumf>, %82, %cst_28 [1] : vector<8x8xf32> to vector<8xf32>
    %84 = vector.shape_cast %83 : vector<8xf32> to vector<8x1xf32>
    %85 = vector.broadcast %84 : vector<8x1xf32> to vector<8x8xf32>
    %86 = arith.subf %82, %85 : vector<8x8xf32>
    %87 = math.exp %86 : vector<8x8xf32>
    %cst_29 = arith.constant dense<0.000000e+00> : vector<8xf32>
    %88 = vector.multi_reduction <add>, %87, %cst_29 [1] : vector<8x8xf32> to vector<8xf32>
    %89 = vector.shape_cast %88 : vector<8xf32> to vector<8x1xf32>
    %cst_30 = arith.constant 1.000000e-30 : f32
    %90 = vector.broadcast %cst_30 : f32 to vector<8x1xf32>
    %91 = arith.maximumf %89, %90 : vector<8x1xf32>
    %92 = vector.broadcast %91 : vector<8x1xf32> to vector<8x8xf32>
    %93 = arith.divf %87, %92 : vector<8x8xf32>
    %94 = arith.truncf %93 : vector<8x8xf32> to vector<8x8xbf16>
    %95 = arith.truncf %71 : vector<8x16xf32> to vector<8x16xbf16>
    %cst_31 = arith.constant dense<0.000000e+00> : vector<8x16xf32>
    %96 = tpu.matmul %94, %95, %cst_31 {dimension_numbers = #tpu.dot_dimension_numbers<[1], [0], [0], [1], [0, 0, 1, 1], [], []>} : vector<8x8xbf16>, vector<8x16xbf16>, vector<8x16xf32> -> vector<8x16xf32>
    %97 = vector.extract_strided_slice %68 {offsets = [0, 16], sizes = [8, 16], strides = [1, 1]} : vector<8x96xf32> to vector<8x16xf32>
    %98 = vector.extract_strided_slice %68 {offsets = [0, 48], sizes = [8, 16], strides = [1, 1]} : vector<8x96xf32> to vector<8x16xf32>
    %99 = vector.extract_strided_slice %68 {offsets = [0, 80], sizes = [8, 16], strides = [1, 1]} : vector<8x96xf32> to vector<8x16xf32>
    %cst_32 = arith.constant 2.500000e-01 : f32
    %100 = vector.broadcast %cst_32 : f32 to vector<8x16xf32>
    %101 = arith.mulf %97, %100 : vector<8x16xf32>
    %102 = arith.truncf %101 : vector<8x16xf32> to vector<8x16xbf16>
    %103 = arith.truncf %98 : vector<8x16xf32> to vector<8x16xbf16>
    %cst_33 = arith.constant dense<0.000000e+00> : vector<8x8xf32>
    %104 = tpu.matmul %102, %103, %cst_33 {dimension_numbers = #tpu.dot_dimension_numbers<[1], [1], [0], [0], [0, 0, 1, 0], [], []>} : vector<8x16xbf16>, vector<8x16xbf16>, vector<8x8xf32> -> vector<8x8xf32>
    %cst_34 = arith.constant 0.000000e+00 : f32
    %105 = vector.broadcast %cst_34 : f32 to vector<1x8xf32>
    %106 = arith.cmpf oeq, %67, %105 : vector<1x8xf32>
    %cst_35 = arith.constant -3.40282347E+38 : f32
    %107 = vector.shape_cast %106 : vector<1x8xi1> to vector<1x8xi1>
    %108 = vector.broadcast %107 : vector<1x8xi1> to vector<8x8xi1>
    %109 = vector.broadcast %cst_35 : f32 to vector<8x8xf32>
    %110 = arith.select %108, %109, %104 : vector<8x8xi1>, vector<8x8xf32>
    %cst_36 = arith.constant dense<0xFF800000> : vector<8xf32>
    %111 = vector.multi_reduction <maximumf>, %110, %cst_36 [1] : vector<8x8xf32> to vector<8xf32>
    %112 = vector.shape_cast %111 : vector<8xf32> to vector<8x1xf32>
    %113 = vector.broadcast %112 : vector<8x1xf32> to vector<8x8xf32>
    %114 = arith.subf %110, %113 : vector<8x8xf32>
    %115 = math.exp %114 : vector<8x8xf32>
    %cst_37 = arith.constant dense<0.000000e+00> : vector<8xf32>
    %116 = vector.multi_reduction <add>, %115, %cst_37 [1] : vector<8x8xf32> to vector<8xf32>
    %117 = vector.shape_cast %116 : vector<8xf32> to vector<8x1xf32>
    %cst_38 = arith.constant 1.000000e-30 : f32
    %118 = vector.broadcast %cst_38 : f32 to vector<8x1xf32>
    %119 = arith.maximumf %117, %118 : vector<8x1xf32>
    %120 = vector.broadcast %119 : vector<8x1xf32> to vector<8x8xf32>
    %121 = arith.divf %115, %120 : vector<8x8xf32>
    %122 = arith.truncf %121 : vector<8x8xf32> to vector<8x8xbf16>
    %123 = arith.truncf %99 : vector<8x16xf32> to vector<8x16xbf16>
    %cst_39 = arith.constant dense<0.000000e+00> : vector<8x16xf32>
    %124 = tpu.matmul %122, %123, %cst_39 {dimension_numbers = #tpu.dot_dimension_numbers<[1], [0], [0], [1], [0, 0, 1, 1], [], []>} : vector<8x8xbf16>, vector<8x16xbf16>, vector<8x16xf32> -> vector<8x16xf32>
    %125 = tpu.concatenate %96, %124 in 1 : vector<8x16xf32>, vector<8x16xf32> -> vector<8x32xf32>
    %126 = tpu.concatenate %66, %125 in 0 : vector<8x32xf32>, vector<8x32xf32> -> vector<16x32xf32>
    %c0_40 = arith.constant 0 : index
    %c0_41 = arith.constant 0 : index
    %127 = vector.load %arg4[%c0_40, %c0_41] : memref<32x32xf32, #tpu.memory_space<vmem>>, vector<32x32xf32>
    %128 = arith.truncf %126 : vector<16x32xf32> to vector<16x32xbf16>
    %129 = arith.truncf %127 : vector<32x32xf32> to vector<32x32xbf16>
    %cst_42 = arith.constant dense<0.000000e+00> : vector<16x32xf32>
    %130 = tpu.matmul %128, %129, %cst_42 {dimension_numbers = #tpu.dot_dimension_numbers<[1], [0], [0], [1], [0, 0, 1, 1], [], []>} : vector<16x32xbf16>, vector<32x32xbf16>, vector<16x32xf32> -> vector<16x32xf32>
    %c0_43 = arith.constant 0 : index
    %c0_44 = arith.constant 0 : index
    %131 = vector.load %arg5[%c0_43, %c0_44] : memref<1x32xf32, #tpu.memory_space<vmem>>, vector<1x32xf32>
    %132 = vector.broadcast %131 : vector<1x32xf32> to vector<16x32xf32>
    %133 = arith.addf %130, %132 : vector<16x32xf32>
    %134 = arith.addf %133, %0 : vector<16x32xf32>
    %c0_45 = arith.constant 0 : index
    %c0_46 = arith.constant 0 : index
    %135 = vector.load %arg6[%c0_45, %c0_46] : memref<1x32xf32, #tpu.memory_space<vmem>>, vector<1x32xf32>
    %c0_47 = arith.constant 0 : index
    %c0_48 = arith.constant 0 : index
    %136 = vector.load %arg7[%c0_47, %c0_48] : memref<1x32xf32, #tpu.memory_space<vmem>>, vector<1x32xf32>
    %cst_49 = arith.constant dense<0.000000e+00> : vector<16xf32>
    %137 = vector.multi_reduction <add>, %134, %cst_49 [1] : vector<16x32xf32> to vector<16xf32>
    %138 = vector.shape_cast %137 : vector<16xf32> to vector<16x1xf32>
    %cst_50 = arith.constant 3.200000e+01 : f32
    %139 = vector.broadcast %cst_50 : f32 to vector<16x1xf32>
    %140 = arith.divf %138, %139 : vector<16x1xf32>
    %141 = vector.broadcast %140 : vector<16x1xf32> to vector<16x32xf32>
    %142 = arith.subf %134, %141 : vector<16x32xf32>
    %143 = arith.mulf %142, %142 : vector<16x32xf32>
    %cst_51 = arith.constant dense<0.000000e+00> : vector<16xf32>
    %144 = vector.multi_reduction <add>, %143, %cst_51 [1] : vector<16x32xf32> to vector<16xf32>
    %145 = vector.shape_cast %144 : vector<16xf32> to vector<16x1xf32>
    %cst_52 = arith.constant 3.200000e+01 : f32
    %146 = vector.broadcast %cst_52 : f32 to vector<16x1xf32>
    %147 = arith.divf %145, %146 : vector<16x1xf32>
    %cst_53 = arith.constant 9.99999996E-13 : f32
    %148 = vector.broadcast %cst_53 : f32 to vector<16x1xf32>
    %149 = arith.addf %147, %148 : vector<16x1xf32>
    %150 = math.rsqrt %149 : vector<16x1xf32>
    %151 = vector.broadcast %150 : vector<16x1xf32> to vector<16x32xf32>
    %152 = arith.mulf %142, %151 : vector<16x32xf32>
    %153 = vector.broadcast %135 : vector<1x32xf32> to vector<16x32xf32>
    %154 = arith.mulf %152, %153 : vector<16x32xf32>
    %155 = vector.broadcast %136 : vector<1x32xf32> to vector<16x32xf32>
    %156 = arith.addf %154, %155 : vector<16x32xf32>
    %c0_54 = arith.constant 0 : index
    %c0_55 = arith.constant 0 : index
    %157 = vector.load %arg8[%c0_54, %c0_55] : memref<32x64xf32, #tpu.memory_space<vmem>>, vector<32x64xf32>
    %158 = arith.truncf %156 : vector<16x32xf32> to vector<16x32xbf16>
    %159 = arith.truncf %157 : vector<32x64xf32> to vector<32x64xbf16>
    %cst_56 = arith.constant dense<0.000000e+00> : vector<16x64xf32>
    %160 = tpu.matmul %158, %159, %cst_56 {dimension_numbers = #tpu.dot_dimension_numbers<[1], [0], [0], [1], [0, 0, 1, 1], [], []>} : vector<16x32xbf16>, vector<32x64xbf16>, vector<16x64xf32> -> vector<16x64xf32>
    %c0_57 = arith.constant 0 : index
    %c0_58 = arith.constant 0 : index
    %161 = vector.load %arg9[%c0_57, %c0_58] : memref<1x64xf32, #tpu.memory_space<vmem>>, vector<1x64xf32>
    %162 = vector.broadcast %161 : vector<1x64xf32> to vector<16x64xf32>
    %163 = arith.addf %160, %162 : vector<16x64xf32>
    %cst_59 = arith.constant 5.000000e-01 : f32
    %164 = vector.broadcast %cst_59 : f32 to vector<16x64xf32>
    %165 = arith.mulf %164, %163 : vector<16x64xf32>
    %cst_60 = arith.constant 0.707106769 : f32
    %166 = vector.broadcast %cst_60 : f32 to vector<16x64xf32>
    %167 = arith.mulf %163, %166 : vector<16x64xf32>
    %168 = math.erf %167 : vector<16x64xf32>
    %cst_61 = arith.constant 1.000000e+00 : f32
    %169 = vector.broadcast %cst_61 : f32 to vector<16x64xf32>
    %170 = arith.addf %169, %168 : vector<16x64xf32>
    %171 = arith.mulf %165, %170 : vector<16x64xf32>
    %c0_62 = arith.constant 0 : index
    %c0_63 = arith.constant 0 : index
    %172 = vector.load %arg10[%c0_62, %c0_63] : memref<64x32xf32, #tpu.memory_space<vmem>>, vector<64x32xf32>
    %173 = arith.truncf %171 : vector<16x64xf32> to vector<16x64xbf16>
    %174 = arith.truncf %172 : vector<64x32xf32> to vector<64x32xbf16>
    %cst_64 = arith.constant dense<0.000000e+00> : vector<16x32xf32>
    %175 = tpu.matmul %173, %174, %cst_64 {dimension_numbers = #tpu.dot_dimension_numbers<[1], [0], [0], [1], [0, 0, 1, 1], [], []>} : vector<16x64xbf16>, vector<64x32xbf16>, vector<16x32xf32> -> vector<16x32xf32>
    %c0_65 = arith.constant 0 : index
    %c0_66 = arith.constant 0 : index
    %176 = vector.load %arg11[%c0_65, %c0_66] : memref<1x32xf32, #tpu.memory_space<vmem>>, vector<1x32xf32>
    %177 = vector.broadcast %176 : vector<1x32xf32> to vector<16x32xf32>
    %178 = arith.addf %175, %177 : vector<16x32xf32>
    %179 = arith.addf %178, %156 : vector<16x32xf32>
    %c0_67 = arith.constant 0 : index
    %c0_68 = arith.constant 0 : index
    %180 = vector.load %arg12[%c0_67, %c0_68] : memref<1x32xf32, #tpu.memory_space<vmem>>, vector<1x32xf32>
    %c0_69 = arith.constant 0 : index
    %c0_70 = arith.constant 0 : index
    %181 = vector.load %arg13[%c0_69, %c0_70] : memref<1x32xf32, #tpu.memory_space<vmem>>, vector<1x32xf32>
    %cst_71 = arith.constant dense<0.000000e+00> : vector<16xf32>
    %182 = vector.multi_reduction <add>, %179, %cst_71 [1] : vector<16x32xf32> to vector<16xf32>
    %183 = vector.shape_cast %182 : vector<16xf32> to vector<16x1xf32>
    %cst_72 = arith.constant 3.200000e+01 : f32
    %184 = vector.broadcast %cst_72 : f32 to vector<16x1xf32>
    %185 = arith.divf %183, %184 : vector<16x1xf32>
    %186 = vector.broadcast %185 : vector<16x1xf32> to vector<16x32xf32>
    %187 = arith.subf %179, %186 : vector<16x32xf32>
    %188 = arith.mulf %187, %187 : vector<16x32xf32>
    %cst_73 = arith.constant dense<0.000000e+00> : vector<16xf32>
    %189 = vector.multi_reduction <add>, %188, %cst_73 [1] : vector<16x32xf32> to vector<16xf32>
    %190 = vector.shape_cast %189 : vector<16xf32> to vector<16x1xf32>
    %cst_74 = arith.constant 3.200000e+01 : f32
    %191 = vector.broadcast %cst_74 : f32 to vector<16x1xf32>
    %192 = arith.divf %190, %191 : vector<16x1xf32>
    %cst_75 = arith.constant 9.99999996E-13 : f32
    %193 = vector.broadcast %cst_75 : f32 to vector<16x1xf32>
    %194 = arith.addf %192, %193 : vector<16x1xf32>
    %195 = math.rsqrt %194 : vector<16x1xf32>
    %196 = vector.broadcast %195 : vector<16x1xf32> to vector<16x32xf32>
    %197 = arith.mulf %187, %196 : vector<16x32xf32>
    %198 = vector.broadcast %180 : vector<1x32xf32> to vector<16x32xf32>
    %199 = arith.mulf %197, %198 : vector<16x32xf32>
    %200 = vector.broadcast %181 : vector<1x32xf32> to vector<16x32xf32>
    %201 = arith.addf %199, %200 : vector<16x32xf32>
    %c0_76 = arith.constant 0 : index
    %c0_77 = arith.constant 0 : index
    %202 = vector.load %arg14[%c0_76, %c0_77] : memref<16x32xf32, #tpu.memory_space<vmem>>, vector<16x32xf32>
    tpu.vector_store %arg14[%c0_76, %c0_77], %201 {strides = array<i32>} : memref<16x32xf32, #tpu.memory_space<vmem>>, vector<16x32xf32>,
    return
  }
}

module attributes {stable_mosaic.version = 11 : i64} {
  func.func @_head_kernel(%arg0: memref<16x32xf32, #tpu.memory_space<vmem>>, %arg1: memref<2x32xf32, #tpu.memory_space<vmem>>, %arg2: memref<32x2xf32, #tpu.memory_space<vmem>>, %arg3: memref<1x2xf32, #tpu.memory_space<vmem>>, %arg4: memref<32x32xf32, #tpu.memory_space<vmem>>, %arg5: memref<1x32xf32, #tpu.memory_space<vmem>>, %arg6: memref<32x32xf32, #tpu.memory_space<vmem>>, %arg7: memref<1x32xf32, #tpu.memory_space<vmem>>, %arg8: memref<32x6xf32, #tpu.memory_space<vmem>>, %arg9: memref<1x6xf32, #tpu.memory_space<vmem>>, %arg10: memref<16x2xf32, #tpu.memory_space<vmem>>, %arg11: memref<1x1xf32, #tpu.memory_space<vmem>>) attributes {dimension_semantics = [], scalar_prefetch = 0 : i64, scratch_operands = 0 : i64, tpu.core_type = #tpu.core_type<tc>} {
    %c0 = arith.constant 0 : index
    %c0_0 = arith.constant 0 : index
    %0 = vector.load %arg0[%c0, %c0_0] : memref<16x32xf32, #tpu.memory_space<vmem>>, vector<16x32xf32>
    %c0_1 = arith.constant 0 : index
    %c0_2 = arith.constant 0 : index
    %1 = vector.load %arg2[%c0_1, %c0_2] : memref<32x2xf32, #tpu.memory_space<vmem>>, vector<32x2xf32>
    %2 = arith.truncf %0 : vector<16x32xf32> to vector<16x32xbf16>
    %3 = arith.truncf %1 : vector<32x2xf32> to vector<32x2xbf16>
    %cst = arith.constant dense<0.000000e+00> : vector<16x2xf32>
    %4 = tpu.matmul %2, %3, %cst {dimension_numbers = #tpu.dot_dimension_numbers<[1], [0], [0], [1], [0, 0, 1, 1], [], []>} : vector<16x32xbf16>, vector<32x2xbf16>, vector<16x2xf32> -> vector<16x2xf32>
    %c0_3 = arith.constant 0 : index
    %c0_4 = arith.constant 0 : index
    %5 = vector.load %arg3[%c0_3, %c0_4] : memref<1x2xf32, #tpu.memory_space<vmem>>, vector<1x2xf32>
    %6 = vector.broadcast %5 : vector<1x2xf32> to vector<16x2xf32>
    %7 = arith.addf %4, %6 : vector<16x2xf32>
    %c0_5 = arith.constant 0 : index
    %c0_6 = arith.constant 0 : index
    %8 = vector.load %arg10[%c0_5, %c0_6] : memref<16x2xf32, #tpu.memory_space<vmem>>, vector<16x2xf32>
    tpu.vector_store %arg10[%c0_5, %c0_6], %7 {strides = array<i32>} : memref<16x2xf32, #tpu.memory_space<vmem>>, vector<16x2xf32>,
    %c0_7 = arith.constant 0 : index
    %c0_8 = arith.constant 0 : index
    %9 = vector.load %arg1[%c0_7, %c0_8] : memref<2x32xf32, #tpu.memory_space<vmem>>, vector<2x32xf32>
    %c0_9 = arith.constant 0 : index
    %c0_10 = arith.constant 0 : index
    %10 = vector.load %arg4[%c0_9, %c0_10] : memref<32x32xf32, #tpu.memory_space<vmem>>, vector<32x32xf32>
    %11 = arith.truncf %9 : vector<2x32xf32> to vector<2x32xbf16>
    %12 = arith.truncf %10 : vector<32x32xf32> to vector<32x32xbf16>
    %cst_11 = arith.constant dense<0.000000e+00> : vector<2x32xf32>
    %13 = tpu.matmul %11, %12, %cst_11 {dimension_numbers = #tpu.dot_dimension_numbers<[1], [0], [0], [1], [0, 0, 1, 1], [], []>} : vector<2x32xbf16>, vector<32x32xbf16>, vector<2x32xf32> -> vector<2x32xf32>
    %c0_12 = arith.constant 0 : index
    %c0_13 = arith.constant 0 : index
    %14 = vector.load %arg5[%c0_12, %c0_13] : memref<1x32xf32, #tpu.memory_space<vmem>>, vector<1x32xf32>
    %15 = vector.broadcast %14 : vector<1x32xf32> to vector<2x32xf32>
    %16 = arith.addf %13, %15 : vector<2x32xf32>
    %cst_14 = arith.constant 0.000000e+00 : f32
    %17 = vector.broadcast %cst_14 : f32 to vector<2x32xf32>
    %18 = arith.maximumf %16, %17 : vector<2x32xf32>
    %c0_15 = arith.constant 0 : index
    %c0_16 = arith.constant 0 : index
    %19 = vector.load %arg6[%c0_15, %c0_16] : memref<32x32xf32, #tpu.memory_space<vmem>>, vector<32x32xf32>
    %20 = arith.truncf %18 : vector<2x32xf32> to vector<2x32xbf16>
    %21 = arith.truncf %19 : vector<32x32xf32> to vector<32x32xbf16>
    %cst_17 = arith.constant dense<0.000000e+00> : vector<2x32xf32>
    %22 = tpu.matmul %20, %21, %cst_17 {dimension_numbers = #tpu.dot_dimension_numbers<[1], [0], [0], [1], [0, 0, 1, 1], [], []>} : vector<2x32xbf16>, vector<32x32xbf16>, vector<2x32xf32> -> vector<2x32xf32>
    %c0_18 = arith.constant 0 : index
    %c0_19 = arith.constant 0 : index
    %23 = vector.load %arg7[%c0_18, %c0_19] : memref<1x32xf32, #tpu.memory_space<vmem>>, vector<1x32xf32>
    %24 = vector.broadcast %23 : vector<1x32xf32> to vector<2x32xf32>
    %25 = arith.addf %22, %24 : vector<2x32xf32>
    %cst_20 = arith.constant 0.000000e+00 : f32
    %26 = vector.broadcast %cst_20 : f32 to vector<2x32xf32>
    %27 = arith.maximumf %25, %26 : vector<2x32xf32>
    %c0_21 = arith.constant 0 : index
    %c0_22 = arith.constant 0 : index
    %28 = vector.load %arg8[%c0_21, %c0_22] : memref<32x6xf32, #tpu.memory_space<vmem>>, vector<32x6xf32>
    %29 = arith.truncf %27 : vector<2x32xf32> to vector<2x32xbf16>
    %30 = arith.truncf %28 : vector<32x6xf32> to vector<32x6xbf16>
    %cst_23 = arith.constant dense<0.000000e+00> : vector<2x6xf32>
    %31 = tpu.matmul %29, %30, %cst_23 {dimension_numbers = #tpu.dot_dimension_numbers<[1], [0], [0], [1], [0, 0, 1, 1], [], []>} : vector<2x32xbf16>, vector<32x6xbf16>, vector<2x6xf32> -> vector<2x6xf32>
    %c0_24 = arith.constant 0 : index
    %c0_25 = arith.constant 0 : index
    %32 = vector.load %arg9[%c0_24, %c0_25] : memref<1x6xf32, #tpu.memory_space<vmem>>, vector<1x6xf32>
    %33 = vector.broadcast %32 : vector<1x6xf32> to vector<2x6xf32>
    %34 = arith.addf %31, %33 : vector<2x6xf32>
    %cst_26 = arith.constant dense<0xFF800000> : vector<2xf32>
    %35 = vector.multi_reduction <maximumf>, %34, %cst_26 [1] : vector<2x6xf32> to vector<2xf32>
    %36 = vector.shape_cast %35 : vector<2xf32> to vector<2x1xf32>
    %37 = vector.broadcast %36 : vector<2x1xf32> to vector<2x6xf32>
    %38 = arith.subf %34, %37 : vector<2x6xf32>
    %39 = math.exp %38 : vector<2x6xf32>
    %cst_27 = arith.constant dense<0.000000e+00> : vector<2xf32>
    %40 = vector.multi_reduction <add>, %39, %cst_27 [1] : vector<2x6xf32> to vector<2xf32>
    %41 = vector.shape_cast %40 : vector<2xf32> to vector<2x1xf32>
    %42 = math.log %41 : vector<2x1xf32>
    %43 = vector.broadcast %42 : vector<2x1xf32> to vector<2x6xf32>
    %44 = arith.subf %38, %43 : vector<2x6xf32>
    %cst_28 = arith.constant -1.79175949 : f32
    %45 = vector.broadcast %cst_28 : f32 to vector<2x6xf32>
    %46 = arith.subf %45, %44 : vector<2x6xf32>
    %cst_29 = arith.constant 0.166666672 : f32
    %47 = vector.broadcast %cst_29 : f32 to vector<2x6xf32>
    %48 = arith.mulf %47, %46 : vector<2x6xf32>
    %cst_30 = arith.constant dense<0.000000e+00> : vector<2xf32>
    %49 = vector.multi_reduction <add>, %48, %cst_30 [1] : vector<2x6xf32> to vector<2xf32>
    %50 = vector.shape_cast %49 : vector<2xf32> to vector<2x1xf32>
    %cst_31 = arith.constant dense<0.000000e+00> : vector<1xf32>
    %51 = vector.multi_reduction <add>, %50, %cst_31 [0] : vector<2x1xf32> to vector<1xf32>
    %52 = vector.shape_cast %51 : vector<1xf32> to vector<1x1xf32>
    %cst_32 = arith.constant 5.000000e-01 : f32
    %53 = vector.broadcast %cst_32 : f32 to vector<1x1xf32>
    %54 = arith.mulf %52, %53 : vector<1x1xf32>
    %c0_33 = arith.constant 0 : index
    %c0_34 = arith.constant 0 : index
    %55 = vector.load %arg11[%c0_33, %c0_34] : memref<1x1xf32, #tpu.memory_space<vmem>>, vector<1x1xf32>
    tpu.vector_store %arg11[%c0_33, %c0_34], %54 {strides = array<i32>} : memref<1x1xf32, #tpu.memory_space<vmem>>, vector<1x1xf32>,
    return
  }
}

</mosaic_0001>

<bundles_post_ra>
// kernel: forward_qa.4
= control target key start
LH: loop header
LB: loop body
LE: loop exit
PB: predicated region body
PF: predicated region fallthrough
CT: control target
= control target key end

     0   :  { %vm24_vm0 = vcmask 261120   ;;  %s132_s0 = inlined_call_operand.vmem [shape: f32[2,8,32], index: 0, kind: input, shape index: {}]   ;;  %s133_s1 = inlined_call_operand.vmem [shape: f32[1,8,32], index: 1, kind: input, shape index: {}]   ;;  %s134_s2 = inlined_call_operand.vmem [shape: f32[1,1,32], index: 2, kind: input, shape index: {}]   ;;  %s135_s3 = inlined_call_operand.vmem [shape: f32[1,1,32], index: 3, kind: input, shape index: {}]   ;;  %s136_s4 = inlined_call_operand.vmem [shape: f32[2,8,32], index: 4, kind: output, shape index: {}]  }
   0x1   :  { %v17_v0 = vld [vmem:[%s132_s0] sm:$0xff]  ;;  %v18_v2 = vld [vmem:[%s132_s0 + $0x8] sm:$0xff] }
   0x2   :  { %v19_v1 = vld [vmem:[%s133_s1] sm:$0xff] }
   0x3   :  { %v20_v3 = vadd.f32 %v19_v1, %v17_v0  ;;  %v21_v4 = vadd.f32 %v19_v1, %v18_v2  ;;  %v74_v24 = vld [vmem:[%s134_s2] ss:$0 sm:$0xff] }
   0x4   :  { %v75_v26 = vld [vmem:[%s135_s3] ss:$0 sm:$0xff] }
   0x5   :  { %v25_v5 = vsel %vm24_vm0, %v20_v3, 0.0  ;;  %v28_v6 = vsel %vm24_vm0, %v21_v4, 0.0 }
   0x6   :  { %26 = vadd.xlane.f32.xlu0 %v25_v5 }
   0xa   :  { %29 = vadd.xlane.f32.xlu0 %v28_v6 }
  0x8f   :  { %v27_v7 = vpop.xlane.xlu0 %26 }
  0x90   :  { %v32_v8 = vmul.f32 0.03125, %v27_v7 }
  0x92   :  { %v34_v9 = vsub.f32 %v20_v3, %v32_v8 }
  0x93   :  { %v30_v10 = vpop.xlane.xlu0 %29 }
  0x94   :  { %v33_v11 = vmul.f32 0.03125, %v30_v10  ;;  %v36_v12 = vmul.f32 %v34_v9, %v34_v9 }
  0x96   :  { %v35_v13 = vsub.f32 %v21_v4, %v33_v11  ;;  %v38_v14 = vsel %vm24_vm0, %v36_v12, 0.0 }
  0x97   :  { %39 = vadd.xlane.f32.xlu1 %v38_v14 }
  0x98   :  { %v37_v15 = vmul.f32 %v35_v13, %v35_v13 }
  0x9a   :  { %v41_v16 = vsel %vm24_vm0, %v37_v15, 0.0 }
  0x9b   :  { %42 = vadd.xlane.f32.xlu1 %v41_v16 }
 0x120   :  { %v40_v17 = vpop.xlane.xlu1 %39 }
 0x121   :  { %v44_v18 = vmul.f32 0.03125, %v40_v17 }
 0x123   :  { %v46_v19 = vadd.f32 1e-12, %v44_v18 }
 0x124   :  { %v43_v20 = vpop.xlane.xlu1 %42 }
 0x125   :  { %76 = vrsqrt.f32 %v46_v19  ;;  %v45_v21 = vmul.f32 0.03125, %v43_v20 }
 0x127   :  { %v47_v22 = vadd.f32 1e-12, %v45_v21 }
 0x129   :  { %78 = vrsqrt.f32 %v47_v22 }
 0x132   :  { %v77_v23 = vpop.eup %76 }
 0x133   :  { %v50_v25 = vmul.f32 %v77_v23, %v34_v9 }
 0x135   :  { %v58_v27 = vmul.f32 %v74_v24, %v50_v25 }
 0x136   :  { %v79_v28 = vpop.eup %78 }
 0x137   :  { %v66_v29 = vadd.f32 %v75_v26, %v58_v27  ;;  %v51_v30 = vmul.f32 %v79_v28, %v35_v13 }
 0x139   :  { %68 = vst.msk [vmem:[%s136_s4] sm:$0xff] %vm24_vm0, %v66_v29  ;;  %v59_v31 = vmul.f32 %v74_v24, %v51_v30 }
 0x13b   :  { %v67_v32 = vadd.f32 %v75_v26, %v59_v31 }
 0x13d   :  { %69 = vst.msk [vmem:[%s136_s4 + $0x8] sm:$0xff] %vm24_vm0, %v67_v32 }

// kernel: forward_qa.7
= control target key start
LH: loop header
LB: loop body
LE: loop exit
PB: predicated region body
PF: predicated region fallthrough
CT: control target
= control target key end

     0   :  { %v405_v3 = vmov 0.0   ;;  %vm406_vm0 = vmmov 0   ;;  %s557_s0 = inlined_call_operand.vmem [shape: f32[16,32], index: 0, kind: input, shape index: {}]   ;;  %s558_s1 = inlined_call_operand.vmem [shape: f32[2,32], index: 1, kind: input, shape index: {}]   ;;  %s559_s2 = inlined_call_operand.vmem [shape: f32[32,2], index: 2, kind: input, shape index: {}]   ;;  %s560_s3 = inlined_call_operand.vmem [shape: f32[1,2], index: 3, kind: input, shape index: {}]   ;;  %s561_s4 = inlined_call_operand.vmem [shape: f32[32,32], index: 4, kind: input, shape index: {}]   ;;  %s562_s5 = inlined_call_operand.vmem [shape: f32[1,32], index: 5, kind: input, shape index: {}]   ;;  %s563_s6 = inlined_call_operand.vmem [shape: f32[32,32], index: 6, kind: input, shape index: {}]   ;;  %s564_s7 = inlined_call_operand.vmem [shape: f32[1,32], index: 7, kind: input, shape index: {}]   ;;  %s565_s8 = inlined_call_operand.vmem [shape: f32[32,6], index: 8, kind: input, shape index: {}]   ;;  %s566_s9 = inlined_call_operand.vmem [shape: f32[1,6], index: 9, kind: input, shape index: {}]   ;;  %s567_s10 = inlined_call_operand.vmem [shape: f32[16,2], index: 10, kind: output, shape index: {0}]   ;;  %s568_s11 = inlined_call_operand.hbm [shape: f32[1,1], index: 11, kind: output, shape index: {1}]  }
   0x1   :  { %v106_v0 = vld [vmem:[%s561_s4 + $0x10] sm:$0xff]  ;;  %v107_v1 = vld [vmem:[%s561_s4 + $0x18] sm:$0xff]  ;;  %v104_v2 = vld [vmem:[%s561_s4] sm:$0xff]  ;;  %352 = vmatprep.subr.bf16.mxu1 %v405_v3  ;;  %356 = vmatprep.mubr.msk.bf16.mxu1 %vm406_vm0, %v405_v3 }
   0x2   :  { %v110_v4 = vpack.c.bf16 %v107_v1, %v106_v0  ;;  %v105_v5 = vld [vmem:[%s561_s4 + $0x8] sm:$0xff]  ;;  %v43_v6 = vld [vmem:[%s559_s2 + $0x10] sm:$0xff]  ;;  %344 = vmatprep.subr.bf16.mxu0 %v405_v3  ;;  %v44_v7 = vld [vmem:[%s559_s2 + $0x18] sm:$0xff]  ;;  %348 = vmatprep.mubr.msk.bf16.mxu0 %vm406_vm0, %v405_v3 }
   0x3   :  { %v41_v8 = vld [vmem:[%s559_s2] sm:$0xff]  ;;  %v42_v9 = vld [vmem:[%s559_s2 + $0x8] sm:$0xff]  ;;  %v109_v10 = vpack.c.bf16 %v105_v5, %v104_v2  ;;  %v47_v12 = vpack.c.bf16 %v44_v7, %v43_v6 }
   0x4   :  { %353 = vmatpush3.bf16.msra.mxu1 %v110_v4  ;;  %v103_v11 = vld [vmem:[%s558_s1] sm:$0x3] }
   0x5   :  { %354 = vmatprep.subr.bf16.mxu1 %v405_v3 }
   0x6   :  { %17 = vsyncpa [#allocation3], 0  ;;  %345 = vmatpush3.bf16.msra.mxu0 %v47_v12  ;;  %v46_v13 = vpack.c.bf16 %v42_v9, %v41_v8  ;;  %v39_v14 = vld [vmem:[%s557_s0] sm:$0xff]  ;;  %v40_v15 = vld [vmem:[%s557_s0 + $0x8] sm:$0xff]  ;;  %v108_v16 = vpack.c.bf16 %v103_v11, %v103_v11  ;;  %vm55_vm1 = vcmask 261120   ;;  %vm100_vm2 = vcmask 15360  }
   0x7   :  { %346 = vmatprep.subr.bf16.mxu0 %v405_v3  ;;  %v164_v17 = vld [vmem:[%s563_s6 + $0x10] sm:$0xff]  ;;  %v165_v18 = vld [vmem:[%s563_s6 + $0x18] sm:$0xff]  ;;  %v45_v19 = vpack.c.bf16 %v40_v15, %v39_v14  ;;  %v162_v21 = vld [vmem:[%s563_s6] sm:$0xff]  ;;  %vm277_vm3 = vcmask 41984   ;;  %vm295_vm4 = vcmask 1041408   ;;  %vm304_vm5 = vcmask 0  }
   0x8   :  { %355 = vmatpush3.bf16.msra.mxu1 %v109_v10  ;;  %v168_v20 = vpack.c.bf16 %v165_v18, %v164_v17  ;;  %v163_v22 = vld [vmem:[%s563_s6 + $0x8] sm:$0xff]  ;;  %v222_v24 = vld [vmem:[%s565_s8 + $0x10] sm:$0xff]  ;;  %v223_v25 = vld [vmem:[%s565_s8 + $0x18] sm:$0xff] }
   0x9   :  { %368 = vmatprep.subr.bf16.mxu1 %v405_v3  ;;  %v167_v23 = vpack.c.bf16 %v163_v22, %v162_v21  ;;  %v226_v26 = vpack.c.bf16 %v223_v25, %v222_v24  ;;  %v326_v27 = vld [vmem:[%s562_s5] ss:$0 sm:$0xff]  ;;  %v221_v43 = vld [vmem:[%s565_s8 + $0x8] sm:$0xff] }
   0xa   :  { %347 = vmatpush3.bf16.msra.mxu0 %v46_v13  ;;  %v324_v29 = vld [vmem:[%s560_s3] ss:$0 sm:$0xff] }
   0xb   :  { %357 = vmatmul.mubr.msk.bf16.vlgmr.msra.gmra.mxu1 %vm55_vm1, %v108_v16  ;;  %360 = vmatprep.subr.bf16.mxu0 %v405_v3  ;;  %v220_v42 = vld [vmem:[%s565_s8] sm:$0xff] }
   0xc   :  { %372 = vmatprep.mubr.msk.bf16.mxu1 %vm406_vm0, %v405_v3  ;;  %369 = vmatpush3.bf16.msra.mxu1 %v226_v26  ;;  %v225_v44 = vpack.c.bf16 %v221_v43, %v220_v42  ;;  %v328_v45 = vld [vmem:[%s564_s7] ss:$0 sm:$0xff]  ;;  %s407_s7 = smov [#allocation2]  }
   0xd   :  { %349 = vmatmul.mubr.msk.bf16.vlgmr.msra.gmra.mxu0 %vm55_vm1, %v45_v19  ;;  %370 = vmatprep.subr.bf16.mxu1 %v405_v3  ;;  %v330_v53 = vld [vmem:[%s566_s9] ss:$0 sm:$0xff]  ;;  %s314_s8 = sshll.u32 %s407_s7, 4  ;;  %s315_s8 = int_to_ptr.vmem [resolvable:$true] %s314_s8 }
   0xe   :  { %361 = vmatpush3.bf16.msra.mxu0 %v168_v20  ;;  %364 = vmatprep.mubr.msk.bf16.mxu0 %vm406_vm0, %v405_v3  ;;  %s383_s9 = scalar_lea.vmem %s315_s8, 16  ;;  %s387_s19 = scalar_lea.vmem %s315_s8, 32 }
   0xf   :  { %362 = vmatprep.subr.bf16.mxu0 %v405_v3  ;;  %p384_p0 = scmp.ne.s32.totalorder %s315_s8, %s383_s9  ;;  %p388_p1 = scmp.lt.s32.totalorder %s315_s8, %s315_s8 }
  0x10   :  { %371 = vmatpush3.bf16.msra.mxu1 %v225_v44  ;;  %p389_p2 = scmp.lt.s32.totalorder %s387_s19, %s383_s9 }
  0x12   :  { %363 = vmatpush3.bf16.msra.mxu0 %v167_v23  ;;  %p390_p3 = por %p389_p2, %p388_p1 }
  0x14   :  { %p391_p4 = pnand %p390_p3, %p384_p0 }
  0xcb   :  { %v155_v28 = vpop.f32.mrf.mxu1 }
  0xcc   :  { %v156_v30 = vadd.f32 %v326_v27, %v155_v28 }
  0xcd   :  { %v358_v31 = vpop.f32.mrf.mxu1  ;;  %v93_v32 = vpop.f32.mrf.mxu0 }
  0xce   :  { %v161_v33 = vmax.f32 %v156_v30, 0.0  ;;  %v94_v34 = vadd.f32 %v324_v29, %v93_v32 }
  0xcf   :  { %v158_v35 = vpop.f32.mrf.mxu1  ;;  %v350_v36 = vpop.f32.mrf.mxu0 }
  0xd0   :  { %v166_v37 = vpack.c.bf16 %v161_v33, %v161_v33  ;;  %101 = vst.msk [vmem:[%s567_s10] sm:$0xff] %vm100_vm2, %v94_v34 }
  0xd1   :  { %v359_v38 = vpop.f32.mrf.mxu1  ;;  %v96_v39 = vpop.f32.mrf.mxu0 }
  0xd2   :  { %365 = vmatmul.mubr.msk.bf16.vlgmr.msra.gmra.mxu0 %vm55_vm1, %v166_v37  ;;  %v97_v40 = vadd.f32 %v324_v29, %v96_v39 }
  0xd3   :  { %v351_v41 = vpop.f32.mrf.mxu0 }
  0xd4   :  { %102 = vst.msk [vmem:[%s567_s10 + $0x8] sm:$0xff] %vm100_vm2, %v97_v40 }
 0x192   :  { %v213_v46 = vpop.f32.mrf.mxu0 }
 0x193   :  { %v214_v47 = vadd.f32 %v328_v45, %v213_v46 }
 0x194   :  { %v366_v48 = vpop.f32.mrf.mxu0 }
 0x195   :  { %v219_v49 = vmax.f32 %v214_v47, 0.0 }
 0x196   :  { %v216_v50 = vpop.f32.mrf.mxu0 }
 0x197   :  { %v224_v51 = vpack.c.bf16 %v219_v49, %v219_v49 }
 0x198   :  { %v367_v52 = vpop.f32.mrf.mxu0 }
 0x199   :  { %373 = vmatmul.mubr.msk.bf16.vlgmr.msra.gmra.mxu1 %vm55_vm1, %v224_v51 }
 0x259   :  { %v271_v54 = vpop.f32.mrf.mxu1 }
 0x25a   :  { %v272_v55 = vadd.f32 %v330_v53, %v271_v54 }
 0x25b   :  { %v374_v56 = vpop.f32.mrf.mxu1 }
 0x25c   :  { %v278_v57 = vsel %vm277_vm3, %v272_v55, -inf }
 0x25d   :  { %279 = vmax.xlane.f32.xlu0 %v278_v57  ;;  %v274_v58 = vpop.f32.mrf.mxu1 }
 0x25f   :  { %v375_v59 = vpop.f32.mrf.mxu1 }
 0x2e6   :  { %v280_v60 = vpop.xlane.xlu0 %279 }
 0x2e7   :  { %v281_v61 = vsub.f32 %v272_v55, %v280_v60 }
 0x2e9   :  { %v282_v62 = vmul.f32 1.442695, %v281_v61 }
 0x2eb   :  { %379 = vpow2.f32 %v282_v62 }
 0x2f8   :  { %v380_v63 = vpop.eup %379 }
 0x2f9   :  { %v284_v0 = vsel %vm277_vm3, %v380_v63, 0.0 }
 0x2fa   :  { %285 = vadd.xlane.f32.xlu0 %v284_v0 }
 0x383   :  { %v286_v1 = vpop.xlane.xlu0 %285 }
 0x384   :  { %381 = vlog2.f32 %v286_v1 }
 0x391   :  { %v382_v2 = vpop.eup %381 }
 0x392   :  { %v288_v3 = vmul.f32 0.6931472, %v382_v2 }
 0x394   :  { %v289_v4 = vsub.f32 %v281_v61, %v288_v3 }
 0x396   :  { %v290_v5 = vsub.f32 -1.7917595, %v289_v4 }
 0x398   :  { %v291_v6 = vmul.f32 0.16666667, %v290_v5 }
 0x39a   :  { %v292_v7 = vsel %vm277_vm3, %v291_v6, 0.0 }
 0x39b   :  { %293 = vadd.xlane.f32.xlu1 %v292_v7 }
 0x424   :  { %v294_v8 = vpop.xlane.xlu1 %293 }
 0x425   :  { %v296_v9 = vsel %vm295_vm4, %v294_v8, 0.0 }
 0x426   :  { %v297_v10 = vrot.slane %v296_v9, 4 }
 0x428   :  { %v298_v11 = vadd.f32 %v297_v10, %v296_v9 }
 0x42a   :  { %v299_v12 = vrot.slane %v298_v11, 2 }
 0x42c   :  { %v300_v13 = vadd.f32 %v299_v12, %v298_v11 }
 0x42e   :  { %v301_v14 = vrot.slane %v300_v13, 1 }
 0x430   :  { %v302_v15 = vadd.f32 %v301_v14, %v300_v13 }
 0x432   :  { %v303_v16 = vmul.f32 0.5, %v302_v15 }
 0x434   :  { %305 = vst.msk [vmem:[#allocation2] sm:$0x1] %vm304_vm5, %v303_v16 }
 0x435   :  { %394 = shalt.err (!%p391_p4)
}
 0x436   :  { %317 = dma.vmem_to_hbm [thread:$0]  %s315_s8, 16, %s568_s11, [#allocation3]  }
 0x437   :  { %403 = dma.done.wait [#allocation3], 16  }
 0x438   :  { %404 = vsyncadd [#allocation3], 4294967280 }
 0x439   :  { %323 = vsyncpa [#allocation3], 1 }

// kernel: forward_qa.5
= control target key start
LH: loop header
LB: loop body
LE: loop exit
PB: predicated region body
PF: predicated region fallthrough
CT: control target
= control target key end

     0   :  { %v1058_v0 = vmov 0.0   ;;  %vm1059_vm0 = vmmov 0   ;;  %vm64_vm1 = vcmask 261120   ;;  %s1061_s26 = smov 112   ;;  %s1062_s27 = smov 80   ;;  %vm116_vm2 = vcmask 130048   ;;  %s1345_s2 = inlined_call_operand.vmem [shape: f32[32,96], index: 2, kind: input, shape index: {}]   ;;  %s1346_s0 = inlined_call_operand.vmem [shape: f32[16,32], index: 0, kind: input, shape index: {}]   ;;  %s1347_s3 = inlined_call_operand.vmem [shape: f32[1,96], index: 3, kind: input, shape index: {}]   ;;  %s1348_s1 = inlined_call_operand.vmem [shape: f32[2,8], index: 1, kind: input, shape index: {}]   ;;  %s1349_s4 = inlined_call_operand.vmem [shape: f32[32,32], index: 4, kind: input, shape index: {}]   ;;  %s1350_s5 = inlined_call_operand.vmem [shape: f32[1,32], index: 5, kind: input, shape index: {}]   ;;  %s1351_s8 = inlined_call_operand.vmem [shape: f32[32,64], index: 8, kind: input, shape index: {}]   ;;  %s1352_s6 = inlined_call_operand.vmem [shape: f32[1,32], index: 6, kind: input, shape index: {}]   ;;  %s1353_s7 = inlined_call_operand.vmem [shape: f32[1,32], index: 7, kind: input, shape index: {}]   ;;  %s1354_s10 = inlined_call_operand.vmem [shape: f32[64,32], index: 10, kind: input, shape index: {}]   ;;  %s1355_s9 = inlined_call_operand.vmem [shape: f32[1,64], index: 9, kind: input, shape index: {}]   ;;  %s1356_s11 = inlined_call_operand.vmem [shape: f32[1,32], index: 11, kind: input, shape index: {}]   ;;  %s1357_s12 = inlined_call_operand.vmem [shape: f32[1,32], index: 12, kind: input, shape index: {}]   ;;  %s1358_s13 = inlined_call_operand.vmem [shape: f32[1,32], index: 13, kind: input, shape index: {}]   ;;  %s1359_s14 = inlined_call_operand.vmem [shape: f32[16,32], index: 14, kind: output, shape index: {}]  }
   0x1   :  { %932 = vmatprep.subr.bf16.mxu0 %v1058_v0  ;;  %v52_v1 = vld [vmem:[%s1345_s2 + $0x10] sm:$0xff]  ;;  %v53_v2 = vld [vmem:[%s1345_s2 + $0x18] sm:$0xff]  ;;  %v50_v3 = vld [vmem:[%s1345_s2] sm:$0xff]  ;;  %936 = vmatprep.mubr.msk.bf16.mxu0 %vm1059_vm0, %v1058_v0  ;;  %v165_v33 = vlaneseq  ;;  %v1063_v37 = vmov 0   ;;  %vm171_vm5 = vcmask 64512   ;;  %s1065_s15 = smov 48  }
   0x2   :  { %v56_v4 = vpack.c.bf16 %v53_v2, %v52_v1  ;;  %v51_v5 = vld [vmem:[%s1345_s2 + $0x8] sm:$0xff]  ;;  %940 = vmatprep.subr.bf16.mxu1 %v1058_v0  ;;  %942 = vmatprep.mubr.msk.bf16.mxu1 %vm1059_vm0, %v1058_v0  ;;  %v1163_v7 = vld [vmem:[%s1346_s0] sm:$0xff]  ;;  %vm190_vm8 = vcmask 1043456   ;;  %s1066_s24 = smov 16   ;;  %vm785_vm9 = vcmask 523264  }
   0x3   :  { %v55_v6 = vpack.c.bf16 %v51_v5, %v50_v3  ;;  %v1168_v8 = vld [vmem:[%s1346_s0 + $0x8] sm:$0xff]  ;;  %v882_v10 = vld [vmem:[%s1347_s3] ss:$0 sm:$0xff]  ;;  %s1060_s0 = smov 96   ;;  %v166_v35 = vshrl.u32 %v165_v33, 7 }
   0x4   :  { %933 = vmatpush3.bf16.msra.mxu0 %v56_v4  ;;  %v54_v9 = vpack.c.bf16 %v1168_v8, %v1163_v7  ;;  %v109_v34 = vld [vmem:[%s1348_s1] sm:$0x1]  ;;  %v352_v42 = vld [vmem:[%s1348_s1 + $0x1] sm:$0x1]  ;;  %s1064_s1 = smov 64  }
   0x5   :  { %934 = vmatprep.subr.bf16.mxu0 %v1058_v0  ;;  %vm163_vm3 = vcmp.eq.f32.partialorder %v109_v34, 0.0  ;;  %v167_v36 = vsub.s32 0, %v166_v35  ;;  %vm405_vm6 = vcmp.eq.f32.partialorder %v352_v42, 0.0 }
   0x6   :  { %v164_v38 = vsel %vm163_vm3, 1, %v1063_v37  ;;  %v406_v47 = vsel %vm405_vm6, 1, %v1063_v37 }
   0x7   :  { %v168_v39 = vrot.slane %v164_v38, %v167_v36  ;;  %v410_v52 = vrot.slane %v406_v47, %v167_v36 }
   0x8   :  { %935 = vmatpush3.bf16.msra.mxu0 %v55_v6 }
   0x9   :  { %946 = vmatprep.subr.bf16.mxu0 %v1058_v0  ;;  %vm169_vm4 = vcmp.eq.s32.totalorder %v168_v39, 1  ;;  %vm411_vm7 = vcmp.eq.s32.totalorder %v410_v52, 1 }
   0xb   :  { %937 = vmatmul.mubr.msk.bf16.vlgmr.msra.gmra.mxu0 %vm64_vm1, %v54_v9 }
   0xc   :  { %948 = vmatprep.mubr.msk.bf16.mxu0 %vm1059_vm0, %v1058_v0 }
  0xcb   :  { %v102_v11 = vpop.f32.mrf.mxu0 }
  0xcc   :  { %v103_v12 = vadd.f32 %v882_v10, %v102_v11 }
  0xcd   :  { %v938_v13 = vpop.f32.mrf.mxu0 }
  0xce   :  { %v1180_v14 = vpack.c.bf16 %v103_v12, %v103_v12  ;;  %v110_v15 = vmul.f32 0.25, %v103_v12 }
  0xcf   :  { %v105_v16 = vpop.f32.mrf.mxu0 }
  0xd0   :  { %v106_v17 = vadd.f32 %v882_v10, %v105_v16  ;;  %114 = vrot.lane.b32.xlu0 %v1180_v14, %s1060_s0  ;;  %v111_v18 = vpack.c.bf16 %v110_v15, %v110_v15 }
  0xd1   :  { %v939_v19 = vpop.f32.mrf.mxu0 }
  0xd2   :  { %235 = vrot.lane.b32.xlu1 %v111_v18, %s1061_s26  ;;  %v353_v20 = vmul.f32 0.25, %v106_v17  ;;  %v1183_v21 = vpack.c.bf16 %v106_v17, %v106_v17 }
  0xd4   :  { %237 = vrot.lane.b32.xlu0 %v1180_v14, %s1062_s27  ;;  %v354_v22 = vpack.c.bf16 %v353_v20, %v353_v20 }
  0xd6   :  { %357 = vrot.lane.b32.xlu1 %v1183_v21, %s1060_s0 }
  0xd8   :  { %477 = vrot.lane.b32.xlu0 %v1183_v21, %s1062_s27 }
  0xda   :  { %475 = vrot.lane.b32.xlu1 %v354_v22, %s1061_s26 }
 0x142   :  { %v115_v23 = vpop.permute.xlu0 %114 }
 0x143   :  { %v121_v24 = vsel %vm116_vm2, %v115_v23, 0 }
 0x144   :  { %941 = vmatpush3.bf16.xpose.msra.mxu1 %v121_v24  ;;  %v236_v26 = vpop.permute.xlu1 %235 }
 0x145   :  { %952 = vmatprep.subr.bf16.mxu1 %v1058_v0 }
 0x146   :  { %v238_v25 = vpop.permute.xlu0 %237 }
 0x147   :  { %v243_v27 = vsel %vm116_vm2, %v238_v25, 0 }
 0x148   :  { %v358_v28 = vpop.permute.xlu1 %357 }
 0x149   :  { %v363_v29 = vsel %vm116_vm2, %v358_v28, 0 }
 0x14a   :  { %v478_v30 = vpop.permute.xlu0 %477 }
 0x14b   :  { %943 = vmatmul.mubr.msk.bf16.vlgmr.msra.gmra.mxu1 %vm116_vm2, %v111_v18  ;;  %v483_v31 = vsel %vm116_vm2, %v478_v30, 0 }
 0x14c   :  { %953 = vmatpush3.bf16.xpose.msra.mxu1 %v243_v27  ;;  %954 = vmatprep.mubr.msk.bf16.mxu1 %vm1059_vm0, %v1058_v0  ;;  %v476_v32 = vpop.permute.xlu1 %475 }
 0x14d   :  { %964 = vmatprep.subr.bf16.mxu1 %v1058_v0 }
 0x153   :  { %955 = vmatmul.mubr.msk.bf16.vlgmr.msra.gmra.mxu1 %vm116_vm2, %v236_v26 }
 0x154   :  { %965 = vmatpush3.bf16.xpose.msra.mxu1 %v363_v29  ;;  %966 = vmatprep.mubr.msk.bf16.mxu1 %vm1059_vm0, %v1058_v0 }
 0x155   :  { %976 = vmatprep.subr.bf16.mxu1 %v1058_v0 }
 0x15b   :  { %967 = vmatmul.mubr.msk.bf16.vlgmr.msra.gmra.mxu1 %vm116_vm2, %v354_v22 }
 0x15c   :  { %977 = vmatpush3.bf16.xpose.msra.mxu1 %v483_v31  ;;  %978 = vmatprep.mubr.msk.bf16.mxu1 %vm1059_vm0, %v1058_v0 }
 0x15d   :  { %988 = vmatprep.subr.bf16.mxu1 %v1058_v0 }
 0x163   :  { %979 = vmatmul.mubr.msk.bf16.vlgmr.msra.gmra.mxu1 %vm116_vm2, %v476_v32 }
 0x164   :  { %992 = vmatprep.mubr.msk.bf16.mxu1 %vm1059_vm0, %v1058_v0 }
 0x20b   :  { %v157_v40 = vpop.f32.mrf.mxu1 }
 0x20c   :  { %v170_v41 = vsel %vm169_vm4, -3.4028235e+38, %v157_v40 }
 0x20d   :  { %v944_v43 = vpop.f32.mrf.mxu1  ;;  %v172_v44 = vsel %vm171_vm5, %v170_v41, -inf }
 0x20e   :  { %173 = vmax.xlane.f32.xlu0 %v172_v44 }
 0x20f   :  { %v160_v45 = vpop.f32.mrf.mxu1 }
 0x211   :  { %v945_v46 = vpop.f32.mrf.mxu1 }
 0x213   :  { %v279_v48 = vpop.f32.mrf.mxu1 }
 0x214   :  { %v285_v49 = vsel %vm169_vm4, -3.4028235e+38, %v279_v48 }
 0x215   :  { %v956_v50 = vpop.f32.mrf.mxu1  ;;  %v286_v51 = vsel %vm171_vm5, %v285_v49, -inf }
 0x216   :  { %287 = vmax.xlane.f32.xlu1 %v286_v51 }
 0x217   :  { %v282_v53 = vpop.f32.mrf.mxu1 }
 0x219   :  { %v957_v54 = vpop.f32.mrf.mxu1 }
 0x21a   :  { %v594_v54 = vld [vmem:[%s1349_s4 + $0x10] sm:$0xff] }
 0x21b   :  { %v399_v55 = vpop.f32.mrf.mxu1 }
 0x21c   :  { %v412_v56 = vsel %vm411_vm7, -3.4028235e+38, %v399_v55  ;;  %v595_v55 = vld [vmem:[%s1349_s4 + $0x18] sm:$0xff] }
 0x21d   :  { %v968_v57 = vpop.f32.mrf.mxu1  ;;  %v413_v58 = vsel %vm171_vm5, %v412_v56, -inf }
 0x21e   :  { %414 = vmax.xlane.f32.xlu0 %v413_v58 }
 0x21f   :  { %v402_v59 = vpop.f32.mrf.mxu1 }
 0x221   :  { %v969_v60 = vpop.f32.mrf.mxu1 }
 0x223   :  { %v519_v61 = vpop.f32.mrf.mxu1 }
 0x224   :  { %v525_v62 = vsel %vm411_vm7, -3.4028235e+38, %v519_v61 }
 0x225   :  { %v980_v63 = vpop.f32.mrf.mxu1  ;;  %v526_v1 = vsel %vm171_vm5, %v525_v62, -inf }
 0x226   :  { %527 = vmax.xlane.f32.xlu0 %v526_v1 }
 0x227   :  { %v522_v2 = vpop.f32.mrf.mxu1 }
 0x228   :  { %v592_v2 = vld [vmem:[%s1349_s4] sm:$0xff] }
 0x229   :  { %v981_v3 = vpop.f32.mrf.mxu1 }
 0x22a   :  { %v593_v3 = vld [vmem:[%s1349_s4 + $0x8] sm:$0xff] }
 0x297   :  { %v174_v4 = vpop.xlane.xlu0 %173 }
 0x298   :  { %v175_v5 = vsub.f32 %v170_v41, %v174_v4  ;;  %v597_v4 = vpack.c.bf16 %v593_v3, %v592_v2  ;;  %v772_v2 = vld [vmem:[%s1354_s10 + $0x38] sm:$0xff] }
 0x29a   :  { %v176_v6 = vmul.f32 1.442695, %v175_v5 }
 0x29c   :  { %1030 = vpow2.f32 %v176_v6 }
 0x29f   :  { %v288_v9 = vpop.xlane.xlu1 %287 }
 0x2a0   :  { %v289_v10 = vsub.f32 %v285_v49, %v288_v9 }
 0x2a2   :  { %v290_v11 = vmul.f32 1.442695, %v289_v10 }
 0x2a4   :  { %1032 = vpow2.f32 %v290_v11 }
 0x2a7   :  { %v415_v15 = vpop.xlane.xlu0 %414 }
 0x2a8   :  { %v416_v24 = vsub.f32 %v412_v56, %v415_v15  ;;  %v598_v56 = vpack.c.bf16 %v595_v55, %v594_v54  ;;  %v894_v55 = vld [vmem:[%s1352_s6] ss:$0 sm:$0xff] }
 0x2a9   :  { %v1031_v12 = vpop.eup %1030 }
 0x2aa   :  { %v178_v13 = vsel %vm171_vm5, %v1031_v12, 0.0  ;;  %v417_v25 = vmul.f32 1.442695, %v416_v24  ;;  %989 = vmatpush3.bf16.msra.mxu1 %v598_v56  ;;  %v892_v24 = vld [vmem:[%s1350_s5] ss:$0 sm:$0xff] }
 0x2ab   :  { %179 = vadd.xlane.f32.xlu1 %v178_v13  ;;  %990 = vmatprep.subr.bf16.mxu1 %v1058_v0 }
 0x2ae   :  { %991 = vmatpush3.bf16.msra.mxu1 %v597_v4  ;;  %v769_v4 = vld [vmem:[%s1354_s10 + $0x20] sm:$0xff] }
 0x2af   :  { %v528_v16 = vpop.xlane.xlu0 %527  ;;  %1004 = vmatprep.subr.bf16.mxu1 %v1058_v0 }
 0x2b0   :  { %v529_v17 = vsub.f32 %v525_v62, %v528_v16 }
 0x2b1   :  { %v1033_v18 = vpop.eup %1032 }
 0x2b2   :  { %v530_v19 = vmul.f32 1.442695, %v529_v17  ;;  %v292_v20 = vsel %vm171_vm5, %v1033_v18, 0.0 }
 0x2b3   :  { %293 = vadd.xlane.f32.xlu0 %v292_v20 }
 0x2b4   :  { %1034 = vpow2.f32 %v530_v19 }
 0x2b5   :  { %1036 = vpow2.f32 %v417_v25 }
 0x2bc   :  { %185 = vrot.lane.b32.xlu1 %v1180_v14, %s1064_s1 }
 0x2c1   :  { %v1035_v22 = vpop.eup %1034 }
 0x2c2   :  { %v532_v23 = vsel %vm171_vm5, %v1035_v22, 0.0  ;;  %v1037_v26 = vpop.eup %1036 }
 0x2c3   :  { %533 = vadd.xlane.f32.xlu0 %v532_v23  ;;  %v419_v27 = vsel %vm171_vm5, %v1037_v26, 0.0 }
 0x2d9   :  { %299 = vrot.lane.b32.xlu0 %v1180_v14, %s1065_s15 }
 0x2e0   :  { %420 = vadd.xlane.f32.xlu1 %v419_v27 }
 0x2f1   :  { %426 = vrot.lane.b32.xlu1 %v1183_v21, %s1064_s1 }
 0x2f5   :  { %539 = vrot.lane.b32.xlu1 %v1183_v21, %s1065_s15 }
 0x334   :  { %v180_v28 = vpop.xlane.xlu1 %179 }
 0x335   :  { %v181_v29 = vmax.f32 %v180_v28, 1e-30 }
 0x337   :  { %1038 = vrcp.f32 %v181_v29 }
 0x338   :  { %v186_v30 = vpop.permute.xlu1 %185 }
 0x339   :  { %v192_v31 = vsel %vm190_vm8, %v186_v30, 0 }
 0x33a   :  { %947 = vmatpush3.bf16.msra.mxu0 %v192_v31 }
 0x33b   :  { %958 = vmatprep.subr.bf16.mxu0 %v1058_v0 }
 0x33c   :  { %v294_v32 = vpop.xlane.xlu0 %293 }
 0x33d   :  { %v295_v14 = vmax.f32 %v294_v32, 1e-30 }
 0x33f   :  { %1040 = vrcp.f32 %v295_v14 }
 0x344   :  { %v1039_v33 = vpop.eup %1038 }
 0x345   :  { %v183_v34 = vmul.f32 %v1039_v33, %v1031_v12 }
 0x347   :  { %v184_v35 = vpack.c.bf16 %v183_v34, %v183_v34 }
 0x349   :  { %949 = vmatmul.mubr.msk.bf16.vlgmr.msra.gmra.mxu0 %vm171_vm5, %v184_v35 }
 0x34a   :  { %960 = vmatprep.mubr.msk.bf16.mxu0 %vm1059_vm0, %v1058_v0 }
 0x34c   :  { %v1041_v21 = vpop.eup %1040  ;;  %v534_v36 = vpop.xlane.xlu0 %533 }
 0x34d   :  { %v297_v37 = vmul.f32 %v1041_v21, %v1033_v18  ;;  %v535_v43 = vmax.f32 %v534_v36, 1e-30 }
 0x34f   :  { %v298_v40 = vpack.c.bf16 %v297_v37, %v297_v37 }
 0x350   :  { %v300_v38 = vpop.permute.xlu0 %299 }
 0x351   :  { %v305_v39 = vsel %vm190_vm8, %v300_v38, 0 }
 0x352   :  { %959 = vmatpush3.bf16.msra.mxu0 %v305_v39 }
 0x353   :  { %970 = vmatprep.subr.bf16.mxu0 %v1058_v0 }
 0x355   :  { %961 = vmatmul.mubr.msk.bf16.vlgmr.msra.gmra.mxu0 %vm171_vm5, %v298_v40 }
 0x356   :  { %972 = vmatprep.mubr.msk.bf16.mxu0 %vm1059_vm0, %v1058_v0 }
 0x369   :  { %v421_v41 = vpop.xlane.xlu1 %420 }
 0x36a   :  { %v422_v42 = vmax.f32 %v421_v41, 1e-30 }
 0x36c   :  { %1042 = vrcp.f32 %v422_v42  ;;  %v700_v42 = vld [vmem:[%s1351_s8 + $0x18] sm:$0xff] }
 0x36d   :  { %v427_v44 = vpop.permute.xlu1 %426  ;;  %1044 = vrcp.f32 %v535_v43 }
 0x36e   :  { %v432_v45 = vsel %vm190_vm8, %v427_v44, 0  ;;  %v697_v44 = vld [vmem:[%s1351_s8] sm:$0xff] }
 0x36f   :  { %971 = vmatpush3.bf16.msra.mxu0 %v432_v45  ;;  %v698_v45 = vld [vmem:[%s1351_s8 + $0x8] sm:$0xff] }
 0x370   :  { %982 = vmatprep.subr.bf16.mxu0 %v1058_v0 }
 0x371   :  { %v540_v48 = vpop.permute.xlu1 %539 }
 0x372   :  { %v545_v51 = vsel %vm190_vm8, %v540_v48, 0 }
 0x379   :  { %v1043_v46 = vpop.eup %1042 }
 0x37a   :  { %v424_v47 = vmul.f32 %v1043_v46, %v1037_v26  ;;  %v1045_v50 = vpop.eup %1044  ;;  %v702_v46 = vpack.c.bf16 %v698_v45, %v697_v44 }
 0x37b   :  { %v537_v52 = vmul.f32 %v1045_v50, %v1035_v22 }
 0x37c   :  { %v425_v49 = vpack.c.bf16 %v424_v47, %v424_v47 }
 0x37d   :  { %v538_v53 = vpack.c.bf16 %v537_v52, %v537_v52 }
 0x37e   :  { %973 = vmatmul.mubr.msk.bf16.vlgmr.msra.gmra.mxu0 %vm171_vm5, %v425_v49 }
 0x37f   :  { %983 = vmatpush3.bf16.msra.mxu0 %v545_v51  ;;  %984 = vmatprep.mubr.msk.bf16.mxu0 %vm1059_vm0, %v1058_v0 }
 0x380   :  { %996 = vmatprep.subr.bf16.mxu0 %v1058_v0 }
 0x386   :  { %985 = vmatmul.mubr.msk.bf16.vlgmr.msra.gmra.mxu0 %vm171_vm5, %v538_v53 }
 0x387   :  { %1000 = vmatprep.mubr.msk.bf16.mxu0 %vm1059_vm0, %v1058_v0 }
 0x409   :  { %v228_v57 = vpop.f32.mrf.mxu0 }
 0x40b   :  { %v950_v58 = vpop.f32.mrf.mxu0 }
 0x40d   :  { %v231_v59 = vpop.f32.mrf.mxu0 }
 0x40e   :  { %v895_v59 = vld [vmem:[%s1353_s7] ss:$0 sm:$0xff] }
 0x40f   :  { %v951_v60 = vpop.f32.mrf.mxu0 }
 0x415   :  { %v341_v61 = vpop.f32.mrf.mxu0 }
 0x417   :  { %v962_v62 = vpop.f32.mrf.mxu0 }
 0x419   :  { %v344_v63 = vpop.f32.mrf.mxu0 }
 0x41b   :  { %v963_v1 = vpop.f32.mrf.mxu0 }
 0x41c   :  { %v771_v1 = vld [vmem:[%s1354_s10 + $0x30] sm:$0xff] }
 0x41d   :  { %v777_v3 = vpack.c.bf16 %v772_v2, %v771_v1 }
 0x43e   :  { %v468_v5 = vpop.f32.mrf.mxu0 }
 0x440   :  { %v974_v6 = vpop.f32.mrf.mxu0 }
 0x442   :  { %v471_v9 = vpop.f32.mrf.mxu0 }
 0x443   :  { %v767_v9 = vld [vmem:[%s1354_s10 + $0x10] sm:$0xff] }
 0x444   :  { %v975_v10 = vpop.f32.mrf.mxu0 }
 0x445   :  { %v768_v10 = vld [vmem:[%s1354_s10 + $0x18] sm:$0xff] }
 0x446   :  { %v581_v11 = vpop.f32.mrf.mxu0 }
 0x447   :  { %v1025_v12 = vpack.i.bf16 %v581_v11, %v341_v61  ;;  %v775_v11 = vpack.c.bf16 %v768_v10, %v767_v9 }
 0x448   :  { %v986_v13 = vpop.f32.mrf.mxu0 }
 0x449   :  { %1026 = vrot.lane.b32.xlu0 %v1025_v12, %s1066_s24  ;;  %v765_v12 = vld [vmem:[%s1354_s10] sm:$0xff]  ;;  %v766_v13 = vld [vmem:[%s1354_s10 + $0x8] sm:$0xff] }
 0x44a   :  { %v584_v15 = vpop.f32.mrf.mxu0 }
 0x44b   :  { %v774_v15 = vpack.c.bf16 %v766_v13, %v765_v12 }
 0x44c   :  { %v987_v16 = vpop.f32.mrf.mxu0 }
 0x44d   :  { %v896_v16 = vld [vmem:[%s1355_s9] ss:$0 sm:$0xff] }
 0x4bb   :  { %v1027_v17 = vpop.permute.xlu0 %1026 }
 0x4bc   :  { %v1029_v18 = vunpack.i.h.bf16 %v1027_v17  ;;  %v1028_v19 = vunpack.i.l.bf16 %v1027_v17 }
 0x4be   :  { %v591_v20 = vsel %vm116_vm2, %v468_v5, %v1029_v18  ;;  %v351_v22 = vsel %vm116_vm2, %v228_v57, %v1028_v19  ;;  %v770_v5 = vld [vmem:[%s1354_s10 + $0x28] sm:$0xff] }
 0x4bf   :  { %v596_v23 = vpack.c.bf16 %v591_v20, %v351_v22  ;;  %v776_v6 = vpack.c.bf16 %v770_v5, %v769_v4 }
 0x4c1   :  { %993 = vmatmul.mubr.msk.bf16.vlgmr.msra.gmra.mxu1 %vm64_vm1, %v596_v23 }
 0x4c2   :  { %1012 = vmatprep.mubr.msk.bf16.mxu1 %vm1059_vm0, %v1058_v0  ;;  %1005 = vmatpush3.bf16.msra.mxu1 %v777_v3 }
 0x4c3   :  { %1006 = vmatprep.subr.bf16.mxu1 %v1058_v0 }
 0x4c6   :  { %1007 = vmatpush3.bf16.msra.mxu1 %v776_v6 }
 0x4c7   :  { %1008 = vmatprep.subr.bf16.mxu1 %v1058_v0 }
 0x4ca   :  { %1009 = vmatpush3.bf16.msra.mxu1 %v775_v11 }
 0x4cb   :  { %1010 = vmatprep.subr.bf16.mxu1 %v1058_v0 }
 0x4ce   :  { %1011 = vmatpush3.bf16.msra.mxu1 %v774_v15 }
 0x581   :  { %v643_v25 = vpop.f32.mrf.mxu1 }
 0x582   :  { %v644_v26 = vadd.f32 %v892_v24, %v643_v25 }
 0x583   :  { %v994_v27 = vpop.f32.mrf.mxu1 }
 0x584   :  { %v650_v28 = vadd.f32 %v644_v26, %v1163_v7 }
 0x585   :  { %v646_v29 = vpop.f32.mrf.mxu1 }
 0x586   :  { %v647_v30 = vadd.f32 %v892_v24, %v646_v29  ;;  %v654_v31 = vsel %vm64_vm1, %v650_v28, 0.0 }
 0x587   :  { %655 = vadd.xlane.f32.xlu1 %v654_v31  ;;  %v995_v32 = vpop.f32.mrf.mxu1 }
 0x588   :  { %v651_v14 = vadd.f32 %v647_v30, %v1168_v8  ;;  %v699_v8 = vld [vmem:[%s1351_s8 + $0x10] sm:$0xff] }
 0x589   :  { %v703_v43 = vpack.c.bf16 %v700_v42, %v699_v8 }
 0x58a   :  { %v657_v33 = vsel %vm64_vm1, %v651_v14, 0.0 }
 0x58b   :  { %658 = vadd.xlane.f32.xlu0 %v657_v33  ;;  %997 = vmatpush3.bf16.msra.mxu0 %v703_v43  ;;  %v898_v33 = vld [vmem:[%s1356_s11] ss:$0 sm:$0xff] }
 0x58c   :  { %998 = vmatprep.subr.bf16.mxu0 %v1058_v0 }
 0x58f   :  { %999 = vmatpush3.bf16.msra.mxu0 %v702_v46 }
 0x610   :  { %v656_v34 = vpop.xlane.xlu1 %655 }
 0x611   :  { %v661_v35 = vmul.f32 0.03125, %v656_v34 }
 0x613   :  { %v663_v21 = vsub.f32 %v650_v28, %v661_v35 }
 0x614   :  { %v659_v36 = vpop.xlane.xlu0 %658 }
 0x615   :  { %v662_v37 = vmul.f32 0.03125, %v659_v36  ;;  %v665_v38 = vmul.f32 %v663_v21, %v663_v21 }
 0x617   :  { %v664_v39 = vsub.f32 %v651_v14, %v662_v37  ;;  %v667_v7 = vsel %vm64_vm1, %v665_v38, 0.0 }
 0x618   :  { %668 = vadd.xlane.f32.xlu0 %v667_v7 }
 0x619   :  { %v666_v40 = vmul.f32 %v664_v39, %v664_v39 }
 0x61b   :  { %v670_v41 = vsel %vm64_vm1, %v666_v40, 0.0 }
 0x61c   :  { %671 = vadd.xlane.f32.xlu1 %v670_v41 }
 0x6a1   :  { %v669_v47 = vpop.xlane.xlu0 %668 }
 0x6a2   :  { %v673_v48 = vmul.f32 0.03125, %v669_v47 }
 0x6a4   :  { %v675_v49 = vadd.f32 1e-12, %v673_v48 }
 0x6a5   :  { %v672_v50 = vpop.xlane.xlu1 %671 }
 0x6a6   :  { %1046 = vrsqrt.f32 %v675_v49  ;;  %v674_v51 = vmul.f32 0.03125, %v672_v50 }
 0x6a8   :  { %v676_v52 = vadd.f32 1e-12, %v674_v51 }
 0x6aa   :  { %1048 = vrsqrt.f32 %v676_v52 }
 0x6b3   :  { %v1047_v53 = vpop.eup %1046 }
 0x6b4   :  { %v679_v54 = vmul.f32 %v1047_v53, %v663_v21 }
 0x6b6   :  { %v687_v58 = vmul.f32 %v894_v55, %v679_v54 }
 0x6b7   :  { %v1049_v56 = vpop.eup %1048 }
 0x6b8   :  { %v680_v57 = vmul.f32 %v1049_v56, %v664_v39  ;;  %v695_v61 = vadd.f32 %v895_v59, %v687_v58  ;;  %v900_v58 = vld [vmem:[%s1357_s12] ss:$0 sm:$0xff] }
 0x6ba   :  { %v688_v60 = vmul.f32 %v894_v55, %v680_v57 }
 0x6bc   :  { %v696_v62 = vadd.f32 %v895_v59, %v688_v60  ;;  %v901_v60 = vld [vmem:[%s1358_s13] ss:$0 sm:$0xff] }
 0x6be   :  { %v701_v63 = vpack.c.bf16 %v696_v62, %v695_v61 }
 0x6c0   :  { %1001 = vmatmul.mubr.msk.bf16.vlgmr.msra.gmra.mxu0 %vm64_vm1, %v701_v63 }
 0x780   :  { %v748_v17 = vpop.f32.mrf.mxu0 }
 0x781   :  { %v749_v18 = vadd.f32 %v896_v16, %v748_v17 }
 0x782   :  { %v1002_v19 = vpop.f32.mrf.mxu0 }
 0x783   :  { %v757_v20 = vmul.f32 0.70710677, %v749_v18  ;;  %v755_v28 = vmul.f32 0.5, %v749_v18 }
 0x784   :  { %v751_v22 = vpop.f32.mrf.mxu0 }
 0x785   :  { %1050 = verf.f32 %v757_v20  ;;  %v752_v0 = vadd.f32 %v896_v16, %v751_v22 }
 0x786   :  { %v1003_v23 = vpop.f32.mrf.mxu0 }
 0x787   :  { %v758_v24 = vmul.f32 0.70710677, %v752_v0  ;;  %v756_v29 = vmul.f32 0.5, %v752_v0 }
 0x789   :  { %1052 = verf.f32 %v758_v24 }
 0x792   :  { %v1051_v25 = vpop.eup %1050 }
 0x793   :  { %v761_v26 = vadd.f32 1.0, %v1051_v25 }
 0x795   :  { %v763_v31 = vmul.f32 %v761_v26, %v755_v28 }
 0x796   :  { %v1053_v27 = vpop.eup %1052 }
 0x797   :  { %v762_v30 = vadd.f32 1.0, %v1053_v27 }
 0x799   :  { %v764_v32 = vmul.f32 %v762_v30, %v756_v29 }
 0x79b   :  { %v773_v14 = vpack.c.bf16 %v764_v32, %v763_v31 }
 0x79d   :  { %1013 = vmatmul.mubr.msk.bf16.vlgmr.msra.gmra.mxu1 %vm785_vm9, %v773_v14 }
 0x85d   :  { %v823_v34 = vpop.f32.mrf.mxu1 }
 0x85e   :  { %v824_v35 = vadd.f32 %v898_v33, %v823_v34 }
 0x85f   :  { %v1014_v21 = vpop.f32.mrf.mxu1 }
 0x860   :  { %v830_v36 = vadd.f32 %v824_v35, %v695_v61 }
 0x861   :  { %v826_v37 = vpop.f32.mrf.mxu1 }
 0x862   :  { %v827_v38 = vadd.f32 %v898_v33, %v826_v37  ;;  %v834_v39 = vsel %vm64_vm1, %v830_v36, 0.0 }
 0x863   :  { %835 = vadd.xlane.f32.xlu0 %v834_v39  ;;  %v1015_v7 = vpop.f32.mrf.mxu1 }
 0x864   :  { %v831_v40 = vadd.f32 %v827_v38, %v696_v62 }
 0x866   :  { %v837_v41 = vsel %vm64_vm1, %v831_v40, 0.0 }
 0x867   :  { %838 = vadd.xlane.f32.xlu1 %v837_v41 }
 0x8ec   :  { %v836_v8 = vpop.xlane.xlu0 %835 }
 0x8ed   :  { %v840_v42 = vmul.f32 0.03125, %v836_v8 }
 0x8ef   :  { %v842_v43 = vsub.f32 %v830_v36, %v840_v42 }
 0x8f0   :  { %v839_v44 = vpop.xlane.xlu1 %838 }
 0x8f1   :  { %v841_v45 = vmul.f32 0.03125, %v839_v44  ;;  %v844_v46 = vmul.f32 %v842_v43, %v842_v43 }
 0x8f3   :  { %v843_v47 = vsub.f32 %v831_v40, %v841_v45  ;;  %v846_v48 = vsel %vm64_vm1, %v844_v46, 0.0 }
 0x8f4   :  { %847 = vadd.xlane.f32.xlu0 %v846_v48 }
 0x8f5   :  { %v845_v49 = vmul.f32 %v843_v47, %v843_v47 }
 0x8f7   :  { %v849_v50 = vsel %vm64_vm1, %v845_v49, 0.0 }
 0x8f8   :  { %850 = vadd.xlane.f32.xlu1 %v849_v50 }
 0x97d   :  { %v848_v51 = vpop.xlane.xlu0 %847 }
 0x97e   :  { %v852_v52 = vmul.f32 0.03125, %v848_v51 }
 0x980   :  { %v854_v53 = vadd.f32 1e-12, %v852_v52 }
 0x981   :  { %v851_v54 = vpop.xlane.xlu1 %850 }
 0x982   :  { %1054 = vrsqrt.f32 %v854_v53  ;;  %v853_v55 = vmul.f32 0.03125, %v851_v54 }
 0x984   :  { %v855_v56 = vadd.f32 1e-12, %v853_v55 }
 0x986   :  { %1056 = vrsqrt.f32 %v855_v56 }
 0x98f   :  { %v1055_v57 = vpop.eup %1054 }
 0x990   :  { %v858_v59 = vmul.f32 %v1055_v57, %v842_v43 }
 0x992   :  { %v866_v61 = vmul.f32 %v900_v58, %v858_v59 }
 0x993   :  { %v1057_v62 = vpop.eup %1056 }
 0x994   :  { %v874_v63 = vadd.f32 %v901_v60, %v866_v61  ;;  %v859_v1 = vmul.f32 %v1057_v62, %v843_v47 }
 0x996   :  { %876 = vst.msk [vmem:[%s1359_s14] sm:$0xff] %vm64_vm1, %v874_v63  ;;  %v867_v2 = vmul.f32 %v900_v58, %v859_v1 }
 0x998   :  { %v875_v3 = vadd.f32 %v901_v60, %v867_v2 }
 0x99a   :  { %877 = vst.msk [vmem:[%s1359_s14 + $0x8] sm:$0xff] %vm64_vm1, %v875_v3 }

</bundles_post_ra>
